<compile_context>
chip_gen: v7x
topology: tpu7x:2x2x1
jax: 0.10.0
libtpu: 0.0.40
codegen_flags: <defaults>
</compile_context>

<pallas_src>
import functools

import jax
import jax.numpy as jnp
from jax.experimental import pallas as pl
from jax.experimental.pallas import tpu as pltpu

F32 = jnp.float32
BF16 = jnp.bfloat16


# ----------------------------- in-kernel helpers -----------------------------

def _ln(x, g, b, eps):
    mu = jnp.mean(x, axis=-1, keepdims=True)
    xc = x - mu
    var = jnp.mean(xc * xc, axis=-1, keepdims=True)
    return xc * jax.lax.rsqrt(var + eps) * g + b


# ----------------------------- Pallas kernels -----------------------------

def _embed_layernorm_kernel(x_ref, g_ref, b_ref, o_ref, *, eps):
    o_ref[...] = _ln(x_ref[...], g_ref[...], b_ref[...], eps)


def embed_layernorm(x, g, b, eps=1e-12):
    n, h = x.shape
    return pl.pallas_call(
        functools.partial(_embed_layernorm_kernel, eps=eps),
        out_shape=jax.ShapeDtypeStruct((n, h), F32),
    )(x, g.reshape(1, h), b.reshape(1, h))


def _bert_layer_kernel(x_ref, bias_ref,
                       qkv_w_ref, qkv_b_ref, ao_w_ref, ao_b_ref,
                       ln1_g_ref, ln1_b_ref,
                       ff1_w_ref, ff1_b_ref, ff2_w_ref, ff2_b_ref,
                       ln2_g_ref, ln2_b_ref,
                       o_ref, *, B, L, heads, dh, eps):
    """Whole BERT encoder layer, fully fused (activations never leave VMEM)."""
    H = heads * dh
    x = x_ref[...]                                        # (N, H) f32
    bias = bias_ref[...]                                  # (B, 1, L) f32

    # Fused QKV projection (bf16 operands, f32 accumulation). 1/sqrt(dh) is
    # pre-folded into the Q columns of qkv_w / qkv_b.
    qkv = jnp.dot(x.astype(BF16), qkv_w_ref[...],
                  preferred_element_type=F32) + qkv_b_ref[...]      # (N, 3H)

    # Per-head attention (static head loop; heads is small).
    ctx_heads = []
    for h_i in range(heads):
        q = qkv[:, h_i * dh:(h_i + 1) * dh].reshape(B, L, dh).astype(BF16)
        k = qkv[:, H + h_i * dh:H + (h_i + 1) * dh].reshape(B, L, dh).astype(BF16)
        v = qkv[:, 2 * H + h_i * dh:2 * H + (h_i + 1) * dh].reshape(B, L, dh).astype(BF16)
        s = jnp.einsum('bqd,bkd->bqk', q, k, preferred_element_type=F32)
        s = s + bias                                       # mask bias, shared across heads
        s = s - jnp.max(s, axis=-1, keepdims=True)
        p = jnp.exp(s)
        p = p * pl.reciprocal(jnp.sum(p, axis=-1, keepdims=True), approx=True)
        ctx_heads.append(jnp.einsum('bqk,bkd->bqd', p.astype(BF16), v,
                                    preferred_element_type=F32))
    ctx = jnp.concatenate(ctx_heads, axis=-1).reshape(B * L, H)

    attn_out = jnp.dot(ctx.astype(BF16), ao_w_ref[...],
                       preferred_element_type=F32) + ao_b_ref[...]
    x1 = _ln(attn_out + x, ln1_g_ref[...], ln1_b_ref[...], eps)

    hmid = jnp.dot(x1.astype(BF16), ff1_w_ref[...],
                   preferred_element_type=F32) + ff1_b_ref[...]
    # TODO(synk): BERT uses the exact erf-GELU; tanh approximation used here.
    hmid = jax.nn.gelu(hmid, approximate=True)
    ffn = jnp.dot(hmid.astype(BF16), ff2_w_ref[...],
                  preferred_element_type=F32) + ff2_b_ref[...]
    o_ref[...] = _ln(ffn + x1, ln2_g_ref[...], ln2_b_ref[...], eps)


def bert_layer(x, mask_bias, p, cfg, B, L):
    H = cfg['hidden']
    heads = cfg['heads']
    dh = H // heads
    return pl.pallas_call(
        functools.partial(_bert_layer_kernel, B=B, L=L, heads=heads, dh=dh,
                          eps=1e-12),
        out_shape=jax.ShapeDtypeStruct((B * L, H), F32),
    )(x, mask_bias,
      p['qkv_w'], p['qkv_b'], p['ao_w'], p['ao_b'],
      p['ln1_g'], p['ln1_b'],
      p['ff1_w'], p['ff1_b'], p['ff2_w'], p['ff2_b'],
      p['ln2_g'], p['ln2_b'])


def _masked_mean_kernel(x_ref, m_ref, o_ref):
    x = x_ref[...]                              # (B, L, H)
    m = m_ref[...]                              # (B, L, 1)
    summed = jnp.sum(x * m, axis=1)             # (B, H)
    count = jnp.sum(m, axis=1)                  # (B, 1)
    o_ref[...] = summed / jnp.maximum(count, 1.0)   # torch.clamp(count, 1)


def _gru_head_kernel(xs_ref, valid_ref, wih_ref, whh_ref, bih_ref, bhh_ref,
                     fc1_w_ref, fc1_b_ref, out_w_ref, out_b_ref,
                     o_ref, gi_scratch, *, S, T, hr):
    """GRU over sentences (packed-seq final hidden) + regression head."""
    Hin = xs_ref.shape[-1]
    xs = xs_ref[...]                            # (T, S, Hin) f32, time-major

    # Hoisted input-to-hidden matmul for all timesteps at once (bf16 -> f32).
    gi = jnp.dot(xs.reshape(T * S, Hin).astype(BF16), wih_ref[...],
                 preferred_element_type=F32) + bih_ref[...]          # (T*S, 3hr)
    gi_scratch[...] = gi.reshape(T, S, 3 * hr)

    whh = whh_ref[...]                          # (hr, 3hr) f32
    bhh = bhh_ref[...]                          # (1, 3hr)  f32

    def step(t, h):
        gi_t = gi_scratch[t]                    # (S, 3hr)
        m = valid_ref[t]                        # (S, 1)  packed-seq mask
        gh = jnp.dot(h, whh, preferred_element_type=F32) + bhh
        r = jax.nn.sigmoid(gi_t[:, :hr] + gh[:, :hr])
        z = jax.nn.sigmoid(gi_t[:, hr:2 * hr] + gh[:, hr:2 * hr])
        n = jnp.tanh(gi_t[:, 2 * hr:] + r * gh[:, 2 * hr:])
        h_new = (1.0 - z) * n + z * h
        return m * h_new + (1.0 - m) * h

    h = jax.lax.fori_loop(0, T, step, jnp.zeros((S, hr), F32), unroll=True)

    # output_layer(relu(fc1(h)))
    y = jnp.maximum(jnp.dot(h, fc1_w_ref[...],
                            preferred_element_type=F32) + fc1_b_ref[...], 0.0)
    o_ref[...] = (jnp.dot(y, out_w_ref[...],
                          preferred_element_type=F32) + out_b_ref[...])


def gru_head(xs, valid, p, cfg):
    T, S, _ = xs.shape
    hr = cfg['hr']
    return pl.pallas_call(
        functools.partial(_gru_head_kernel, S=S, T=T, hr=hr),
        out_shape=jax.ShapeDtypeStruct((S, 1), F32),
        scratch_shapes=[pltpu.VMEM((T, S, 3 * hr), F32)],
    )(xs, valid,
      p['gru_wih'], p['gru_whh'], p['gru_bih'], p['gru_bhh'],
      p['fc1_w'], p['fc1_b'], p['out_w'], p['out_b'])


# ----------------------------- model assembly -----------------------------

def robert_forward(params, input_ids, num_sentences_per_school,
                   attention_mask, cfg):
    n_schools, n_sent, max_len = input_ids.shape
    H = cfg['hidden']

    inputs = input_ids.reshape(-1, max_len)                      # (B, L)
    attends = attention_mask.reshape(-1, max_len).astype(F32)    # (B, L)
    B, L = inputs.shape

    # --- BERT embeddings (gather = glue) + residual-free LayerNorm kernel ---
    emb = (params['word_emb'][inputs]
           + params['pos_emb'][:L][None, :, :]
           + params['type_emb'][0][None, None, :])
    x = embed_layernorm(emb.reshape(B * L, H),
                        params['emb_ln_g'], params['emb_ln_b'])

    # Extended attention mask bias, kept (B, 1, L); broadcast over heads
    # happens inside the fused layer kernel (no jnp.repeat).
    mask_bias = ((1.0 - attends) * -10000.0).reshape(B, 1, L)

    for lp in params['layers']:
        x = bert_layer(x, mask_bias, lp, cfg, B, L)
    bert_last = x.reshape(B, L, H)

    # --- masked mean pooling over tokens (Pallas) ---
    sent_embs = pl.pallas_call(
        _masked_mean_kernel,
        out_shape=jax.ShapeDtypeStruct((B, H), F32),
    )(bert_last, attends[:, :, None])
    # dropout: identity at inference

    # --- GRU over sentences + regression head (single fused Pallas kernel) ---
    xs = sent_embs.reshape(n_schools, n_sent, H).transpose(1, 0, 2)   # (T, S, H)
    valid = (jnp.arange(n_sent)[:, None]
             < num_sentences_per_school[None, :]).astype(F32)[:, :, None]  # (T, S, 1)
    target_pred = gru_head(xs, valid, params, cfg)

    confounds_pred = None   # num_output == 1 (grad_reverse is identity fwd)
    return target_pred, confounds_pred


# ----------------------------- parameters -----------------------------

def init_params(key, cfg):
    H, I, Hr = cfg['hidden'], cfg['inter'], cfg['hr']
    V, P = cfg['vocab'], cfg['max_pos']
    heads = cfg['heads']
    dh = H // heads
    scale = 1.0 / (dh ** 0.5)
    keys = iter(jax.random.split(key, 96))

    def nrm(shape, dtype=F32):
        return (0.02 * jax.random.normal(next(keys), shape, F32)).astype(dtype)

    p = {
        'word_emb': nrm((V, H)),
        'pos_emb': nrm((P, H)),
        'type_emb': nrm((2, H)),
        'emb_ln_g': jnp.ones((H,), F32),
        'emb_ln_b': jnp.zeros((H,), F32),
        'layers': [],
    }
    for _ in range(cfg['layers']):
        q_w, k_w, v_w = nrm((H, H)), nrm((H, H)), nrm((H, H))
        q_b = jnp.zeros((H,), F32)
        k_b = jnp.zeros((H,), F32)
        v_b = jnp.zeros((H,), F32)
        # Fuse Q/K/V into one (H, 3H) matmul; fold 1/sqrt(dh) into Q. bf16 weights.
        qkv_w = jnp.concatenate([q_w * scale, k_w, v_w], axis=1).astype(BF16)
        qkv_b = jnp.concatenate([q_b * scale, k_b, v_b]).reshape(1, 3 * H)
        p['layers'].append({
            'qkv_w': qkv_w, 'qkv_b': qkv_b,
            'ao_w': nrm((H, H), BF16), 'ao_b': jnp.zeros((1, H), F32),
            'ln1_g': jnp.ones((1, H), F32), 'ln1_b': jnp.zeros((1, H), F32),
            'ff1_w': nrm((H, I), BF16), 'ff1_b': jnp.zeros((1, I), F32),
            'ff2_w': nrm((I, H), BF16), 'ff2_b': jnp.zeros((1, H), F32),
            'ln2_g': jnp.ones((1, H), F32), 'ln2_b': jnp.zeros((1, H), F32),
        })
    # GRU (PyTorch layout W_ih: (3*Hr, Hin); stored transposed, gate order r|z|n)
    p['gru_wih'] = nrm((H, 3 * Hr), BF16)     # input matmul in bf16 (hoisted, large)
    p['gru_whh'] = nrm((Hr, 3 * Hr))          # recurrent matmul kept f32 (tiny, accuracy)
    p['gru_bih'] = jnp.zeros((1, 3 * Hr), F32)
    p['gru_bhh'] = jnp.zeros((1, 3 * Hr), F32)
    # regression head
    p['fc1_w'] = nrm((Hr, Hr))
    p['fc1_b'] = jnp.zeros((1, Hr), F32)
    p['out_w'] = nrm((Hr, 1))
    p['out_b'] = jnp.zeros((1, 1), F32)
    return p


# ----------------------------- main -----------------------------

if __name__ == "__main__":
    cfg = dict(vocab=50, hidden=32, heads=2, layers=2, inter=64,
               max_pos=16, hr=16)
    n_schools, n_sent, max_len = 2, 3, 8

    key = jax.random.PRNGKey(0)
    kparam, kids = jax.random.split(key)
    params = init_params(kparam, cfg)

    input_ids = jax.random.randint(kids, (n_schools, n_sent, max_len),
                                   0, cfg['vocab'], dtype=jnp.int32)
    tok_lens = jnp.array([[8, 6, 5], [7, 4, 8]], dtype=jnp.int32)
    attention_mask = (jnp.arange(max_len)[None, None, :]
                      < tok_lens[:, :, None]).astype(jnp.int32)
    # sorted descending, as pack_padded_sequence(enforce_sorted=True) requires
    num_sentences_per_school = jnp.array([3, 2], dtype=jnp.int32)

    fwd = jax.jit(lambda p, ids, ns, am: robert_forward(p, ids, ns, am, cfg))
    target_pred, confounds_pred = fwd(params, input_ids,
                                      num_sentences_per_school,
                                      attention_mask)
    jax.block_until_ready(target_pred)
    assert target_pred.shape == (n_schools, 1)
    assert confounds_pred is None
    print("KERNEL_OK")
</pallas_src>

<mosaic_0001>
module attributes {stable_mosaic.version = 11 : i64} {
  func.func @_embed_layernorm_kernel(%arg0: memref<48x32xf32, #tpu.memory_space<vmem>>, %arg1: memref<1x32xf32, #tpu.memory_space<vmem>>, %arg2: memref<1x32xf32, #tpu.memory_space<vmem>>, %arg3: memref<48x32xf32, #tpu.memory_space<vmem>>) attributes {dimension_semantics = [], scalar_prefetch = 0 : i64, scratch_operands = 0 : i64, tpu.core_type = #tpu.core_type<tc>} {
    %c0 = arith.constant 0 : index
    %c0_0 = arith.constant 0 : index
    %0 = vector.load %arg0[%c0, %c0_0] : memref<48x32xf32, #tpu.memory_space<vmem>>, vector<48x32xf32>
    %c0_1 = arith.constant 0 : index
    %c0_2 = arith.constant 0 : index
    %1 = vector.load %arg1[%c0_1, %c0_2] : memref<1x32xf32, #tpu.memory_space<vmem>>, vector<1x32xf32>
    %c0_3 = arith.constant 0 : index
    %c0_4 = arith.constant 0 : index
    %2 = vector.load %arg2[%c0_3, %c0_4] : memref<1x32xf32, #tpu.memory_space<vmem>>, vector<1x32xf32>
    %cst = arith.constant dense<0.000000e+00> : vector<48xf32>
    %3 = vector.multi_reduction <add>, %0, %cst [1] : vector<48x32xf32> to vector<48xf32>
    %4 = vector.shape_cast %3 : vector<48xf32> to vector<48x1xf32>
    %cst_5 = arith.constant 3.200000e+01 : f32
    %5 = vector.broadcast %cst_5 : f32 to vector<48x1xf32>
    %6 = arith.divf %4, %5 : vector<48x1xf32>
    %7 = vector.broadcast %6 : vector<48x1xf32> to vector<48x32xf32>
    %8 = arith.subf %0, %7 : vector<48x32xf32>
    %9 = arith.mulf %8, %8 : vector<48x32xf32>
    %cst_6 = arith.constant dense<0.000000e+00> : vector<48xf32>
    %10 = vector.multi_reduction <add>, %9, %cst_6 [1] : vector<48x32xf32> to vector<48xf32>
    %11 = vector.shape_cast %10 : vector<48xf32> to vector<48x1xf32>
    %cst_7 = arith.constant 3.200000e+01 : f32
    %12 = vector.broadcast %cst_7 : f32 to vector<48x1xf32>
    %13 = arith.divf %11, %12 : vector<48x1xf32>
    %cst_8 = arith.constant 9.99999996E-13 : f32
    %14 = vector.broadcast %cst_8 : f32 to vector<48x1xf32>
    %15 = arith.addf %13, %14 : vector<48x1xf32>
    %16 = math.rsqrt %15 : vector<48x1xf32>
    %17 = vector.broadcast %16 : vector<48x1xf32> to vector<48x32xf32>
    %18 = arith.mulf %8, %17 : vector<48x32xf32>
    %19 = vector.broadcast %1 : vector<1x32xf32> to vector<48x32xf32>
    %20 = arith.mulf %18, %19 : vector<48x32xf32>
    %21 = vector.broadcast %2 : vector<1x32xf32> to vector<48x32xf32>
    %22 = arith.addf %20, %21 : vector<48x32xf32>
    %c0_9 = arith.constant 0 : index
    %c0_10 = arith.constant 0 : index
    %23 = vector.load %arg3[%c0_9, %c0_10] : memref<48x32xf32, #tpu.memory_space<vmem>>, vector<48x32xf32>
    tpu.vector_store %arg3[%c0_9, %c0_10], %22 {strides = array<i32>} : memref<48x32xf32, #tpu.memory_space<vmem>>, vector<48x32xf32>,
    return
  }
}

module attributes {stable_mosaic.version = 11 : i64} {
  func.func @_bert_layer_kernel(%arg0: memref<48x32xf32, #tpu.memory_space<vmem>>, %arg1: memref<6x1x8xf32, #tpu.memory_space<vmem>>, %arg2: memref<32x96xbf16, #tpu.memory_space<vmem>>, %arg3: memref<1x96xf32, #tpu.memory_space<vmem>>, %arg4: memref<32x32xbf16, #tpu.memory_space<vmem>>, %arg5: memref<1x32xf32, #tpu.memory_space<vmem>>, %arg6: memref<1x32xf32, #tpu.memory_space<vmem>>, %arg7: memref<1x32xf32, #tpu.memory_space<vmem>>, %arg8: memref<32x64xbf16, #tpu.memory_space<vmem>>, %arg9: memref<1x64xf32, #tpu.memory_space<vmem>>, %arg10: memref<64x32xbf16, #tpu.memory_space<vmem>>, %arg11: memref<1x32xf32, #tpu.memory_space<vmem>>, %arg12: memref<1x32xf32, #tpu.memory_space<vmem>>, %arg13: memref<1x32xf32, #tpu.memory_space<vmem>>, %arg14: memref<48x32xf32, #tpu.memory_space<vmem>>) attributes {dimension_semantics = [], scalar_prefetch = 0 : i64, scratch_operands = 0 : i64, tpu.core_type = #tpu.core_type<tc>} {
    %c0 = arith.constant 0 : index
    %c0_0 = arith.constant 0 : index
    %0 = vector.load %arg0[%c0, %c0_0] : memref<48x32xf32, #tpu.memory_space<vmem>>, vector<48x32xf32>
    %c0_1 = arith.constant 0 : index
    %c0_2 = arith.constant 0 : index
    %c0_3 = arith.constant 0 : index
    %1 = vector.load %arg1[%c0_1, %c0_2, %c0_3] : memref<6x1x8xf32, #tpu.memory_space<vmem>>, vector<6x1x8xf32>
    %2 = arith.truncf %0 : vector<48x32xf32> to vector<48x32xbf16>
    %c0_4 = arith.constant 0 : index
    %c0_5 = arith.constant 0 : index
    %3 = vector.load %arg2[%c0_4, %c0_5] : memref<32x96xbf16, #tpu.memory_space<vmem>>, vector<32x96xbf16>
    %cst = arith.constant dense<0.000000e+00> : vector<48x96xf32>
    %4 = tpu.matmul %2, %3, %cst {dimension_numbers = #tpu.dot_dimension_numbers<[1], [0], [0], [1], [0, 0, 1, 1], [], []>} : vector<48x32xbf16>, vector<32x96xbf16>, vector<48x96xf32> -> vector<48x96xf32>
    %c0_6 = arith.constant 0 : index
    %c0_7 = arith.constant 0 : index
    %5 = vector.load %arg3[%c0_6, %c0_7] : memref<1x96xf32, #tpu.memory_space<vmem>>, vector<1x96xf32>
    %6 = vector.broadcast %5 : vector<1x96xf32> to vector<48x96xf32>
    %7 = arith.addf %4, %6 : vector<48x96xf32>
    %8 = vector.extract_strided_slice %7 {offsets = [0, 0], sizes = [48, 16], strides = [1, 1]} : vector<48x96xf32> to vector<48x16xf32>
    %9 = vector.shape_cast %8 : vector<48x16xf32> to vector<6x8x16xf32>
    %10 = arith.truncf %9 : vector<6x8x16xf32> to vector<6x8x16xbf16>
    %11 = vector.extract_strided_slice %7 {offsets = [0, 32], sizes = [48, 16], strides = [1, 1]} : vector<48x96xf32> to vector<48x16xf32>
    %12 = vector.shape_cast %11 : vector<48x16xf32> to vector<6x8x16xf32>
    %13 = arith.truncf %12 : vector<6x8x16xf32> to vector<6x8x16xbf16>
    %14 = vector.extract_strided_slice %7 {offsets = [0, 64], sizes = [48, 16], strides = [1, 1]} : vector<48x96xf32> to vector<48x16xf32>
    %15 = vector.shape_cast %14 : vector<48x16xf32> to vector<6x8x16xf32>
    %16 = arith.truncf %15 : vector<6x8x16xf32> to vector<6x8x16xbf16>
    "tpu.trace_start"() <{level = 10 : i32, message = "bqd,bkd->bqk"}> : () -> ()
    %cst_8 = arith.constant dense<0.000000e+00> : vector<6x8x8xf32>
    %17 = tpu.matmul %10, %13, %cst_8 {dimension_numbers = #tpu.dot_dimension_numbers<[2], [2], [1], [1], [0, 0, 0, 1, 1, 1], [0], [0]>} : vector<6x8x16xbf16>, vector<6x8x16xbf16>, vector<6x8x8xf32> -> vector<6x8x8xf32>
    "tpu.trace_stop"() : () -> ()
    %18 = vector.broadcast %1 : vector<6x1x8xf32> to vector<6x8x8xf32>
    %19 = arith.addf %17, %18 : vector<6x8x8xf32>
    %cst_9 = arith.constant dense<0xFF800000> : vector<6x8xf32>
    %20 = vector.multi_reduction <maximumf>, %19, %cst_9 [2] : vector<6x8x8xf32> to vector<6x8xf32>
    %21 = vector.shape_cast %20 : vector<6x8xf32> to vector<6x8x1xf32>
    %22 = vector.broadcast %21 : vector<6x8x1xf32> to vector<6x8x8xf32>
    %23 = arith.subf %19, %22 : vector<6x8x8xf32>
    %24 = math.exp %23 : vector<6x8x8xf32>
    %cst_10 = arith.constant dense<0.000000e+00> : vector<6x8xf32>
    %25 = vector.multi_reduction <add>, %24, %cst_10 [2] : vector<6x8x8xf32> to vector<6x8xf32>
    %26 = vector.shape_cast %25 : vector<6x8xf32> to vector<6x8x1xf32>
    %27 = tpu.reciprocal %26 {approx = true} : vector<6x8x1xf32> -> vector<6x8x1xf32>
    %28 = vector.broadcast %27 : vector<6x8x1xf32> to vector<6x8x8xf32>
    %29 = arith.mulf %24, %28 : vector<6x8x8xf32>
    %30 = arith.truncf %29 : vector<6x8x8xf32> to vector<6x8x8xbf16>
    "tpu.trace_start"() <{level = 10 : i32, message = "bqk,bkd->bqd"}> : () -> ()
    %cst_11 = arith.constant dense<0.000000e+00> : vector<6x8x16xf32>
    %31 = tpu.matmul %30, %16, %cst_11 {dimension_numbers = #tpu.dot_dimension_numbers<[2], [1], [1], [2], [0, 0, 0, 1, 1, 2], [0], [0]>} : vector<6x8x8xbf16>, vector<6x8x16xbf16>, vector<6x8x16xf32> -> vector<6x8x16xf32>
    "tpu.trace_stop"() : () -> ()
    %32 = vector.extract_strided_slice %7 {offsets = [0, 16], sizes = [48, 16], strides = [1, 1]} : vector<48x96xf32> to vector<48x16xf32>
    %33 = vector.shape_cast %32 : vector<48x16xf32> to vector<6x8x16xf32>
    %34 = arith.truncf %33 : vector<6x8x16xf32> to vector<6x8x16xbf16>
    %35 = vector.extract_strided_slice %7 {offsets = [0, 48], sizes = [48, 16], strides = [1, 1]} : vector<48x96xf32> to vector<48x16xf32>
    %36 = vector.shape_cast %35 : vector<48x16xf32> to vector<6x8x16xf32>
    %37 = arith.truncf %36 : vector<6x8x16xf32> to vector<6x8x16xbf16>
    %38 = vector.extract_strided_slice %7 {offsets = [0, 80], sizes = [48, 16], strides = [1, 1]} : vector<48x96xf32> to vector<48x16xf32>
    %39 = vector.shape_cast %38 : vector<48x16xf32> to vector<6x8x16xf32>
    %40 = arith.truncf %39 : vector<6x8x16xf32> to vector<6x8x16xbf16>
    "tpu.trace_start"() <{level = 10 : i32, message = "bqd,bkd->bqk"}> : () -> ()
    %cst_12 = arith.constant dense<0.000000e+00> : vector<6x8x8xf32>
    %41 = tpu.matmul %34, %37, %cst_12 {dimension_numbers = #tpu.dot_dimension_numbers<[2], [2], [1], [1], [0, 0, 0, 1, 1, 1], [0], [0]>} : vector<6x8x16xbf16>, vector<6x8x16xbf16>, vector<6x8x8xf32> -> vector<6x8x8xf32>
    "tpu.trace_stop"() : () -> ()
    %42 = vector.broadcast %1 : vector<6x1x8xf32> to vector<6x8x8xf32>
    %43 = arith.addf %41, %42 : vector<6x8x8xf32>
    %cst_13 = arith.constant dense<0xFF800000> : vector<6x8xf32>
    %44 = vector.multi_reduction <maximumf>, %43, %cst_13 [2] : vector<6x8x8xf32> to vector<6x8xf32>
    %45 = vector.shape_cast %44 : vector<6x8xf32> to vector<6x8x1xf32>
    %46 = vector.broadcast %45 : vector<6x8x1xf32> to vector<6x8x8xf32>
    %47 = arith.subf %43, %46 : vector<6x8x8xf32>
    %48 = math.exp %47 : vector<6x8x8xf32>
    %cst_14 = arith.constant dense<0.000000e+00> : vector<6x8xf32>
    %49 = vector.multi_reduction <add>, %48, %cst_14 [2] : vector<6x8x8xf32> to vector<6x8xf32>
    %50 = vector.shape_cast %49 : vector<6x8xf32> to vector<6x8x1xf32>
    %51 = tpu.reciprocal %50 {approx = true} : vector<6x8x1xf32> -> vector<6x8x1xf32>
    %52 = vector.broadcast %51 : vector<6x8x1xf32> to vector<6x8x8xf32>
    %53 = arith.mulf %48, %52 : vector<6x8x8xf32>
    %54 = arith.truncf %53 : vector<6x8x8xf32> to vector<6x8x8xbf16>
    "tpu.trace_start"() <{level = 10 : i32, message = "bqk,bkd->bqd"}> : () -> ()
    %cst_15 = arith.constant dense<0.000000e+00> : vector<6x8x16xf32>
    %55 = tpu.matmul %54, %40, %cst_15 {dimension_numbers = #tpu.dot_dimension_numbers<[2], [1], [1], [2], [0, 0, 0, 1, 1, 2], [0], [0]>} : vector<6x8x8xbf16>, vector<6x8x16xbf16>, vector<6x8x16xf32> -> vector<6x8x16xf32>
    "tpu.trace_stop"() : () -> ()
    %56 = tpu.concatenate %31, %55 in 2 : vector<6x8x16xf32>, vector<6x8x16xf32> -> vector<6x8x32xf32>
    %57 = vector.shape_cast %56 : vector<6x8x32xf32> to vector<48x32xf32>
    %58 = arith.truncf %57 : vector<48x32xf32> to vector<48x32xbf16>
    %c0_16 = arith.constant 0 : index
    %c0_17 = arith.constant 0 : index
    %59 = vector.load %arg4[%c0_16, %c0_17] : memref<32x32xbf16, #tpu.memory_space<vmem>>, vector<32x32xbf16>
    %cst_18 = arith.constant dense<0.000000e+00> : vector<48x32xf32>
    %60 = tpu.matmul %58, %59, %cst_18 {dimension_numbers = #tpu.dot_dimension_numbers<[1], [0], [0], [1], [0, 0, 1, 1], [], []>} : vector<48x32xbf16>, vector<32x32xbf16>, vector<48x32xf32> -> vector<48x32xf32>
    %c0_19 = arith.constant 0 : index
    %c0_20 = arith.constant 0 : index
    %61 = vector.load %arg5[%c0_19, %c0_20] : memref<1x32xf32, #tpu.memory_space<vmem>>, vector<1x32xf32>
    %62 = vector.broadcast %61 : vector<1x32xf32> to vector<48x32xf32>
    %63 = arith.addf %60, %62 : vector<48x32xf32>
    %64 = arith.addf %63, %0 : vector<48x32xf32>
    %c0_21 = arith.constant 0 : index
    %c0_22 = arith.constant 0 : index
    %65 = vector.load %arg6[%c0_21, %c0_22] : memref<1x32xf32, #tpu.memory_space<vmem>>, vector<1x32xf32>
    %c0_23 = arith.constant 0 : index
    %c0_24 = arith.constant 0 : index
    %66 = vector.load %arg7[%c0_23, %c0_24] : memref<1x32xf32, #tpu.memory_space<vmem>>, vector<1x32xf32>
    %cst_25 = arith.constant dense<0.000000e+00> : vector<48xf32>
    %67 = vector.multi_reduction <add>, %64, %cst_25 [1] : vector<48x32xf32> to vector<48xf32>
    %68 = vector.shape_cast %67 : vector<48xf32> to vector<48x1xf32>
    %cst_26 = arith.constant 3.200000e+01 : f32
    %69 = vector.broadcast %cst_26 : f32 to vector<48x1xf32>
    %70 = arith.divf %68, %69 : vector<48x1xf32>
    %71 = vector.broadcast %70 : vector<48x1xf32> to vector<48x32xf32>
    %72 = arith.subf %64, %71 : vector<48x32xf32>
    %73 = arith.mulf %72, %72 : vector<48x32xf32>
    %cst_27 = arith.constant dense<0.000000e+00> : vector<48xf32>
    %74 = vector.multi_reduction <add>, %73, %cst_27 [1] : vector<48x32xf32> to vector<48xf32>
    %75 = vector.shape_cast %74 : vector<48xf32> to vector<48x1xf32>
    %cst_28 = arith.constant 3.200000e+01 : f32
    %76 = vector.broadcast %cst_28 : f32 to vector<48x1xf32>
    %77 = arith.divf %75, %76 : vector<48x1xf32>
    %cst_29 = arith.constant 9.99999996E-13 : f32
    %78 = vector.broadcast %cst_29 : f32 to vector<48x1xf32>
    %79 = arith.addf %77, %78 : vector<48x1xf32>
    %80 = math.rsqrt %79 : vector<48x1xf32>
    %81 = vector.broadcast %80 : vector<48x1xf32> to vector<48x32xf32>
    %82 = arith.mulf %72, %81 : vector<48x32xf32>
    %83 = vector.broadcast %65 : vector<1x32xf32> to vector<48x32xf32>
    %84 = arith.mulf %82, %83 : vector<48x32xf32>
    %85 = vector.broadcast %66 : vector<1x32xf32> to vector<48x32xf32>
    %86 = arith.addf %84, %85 : vector<48x32xf32>
    %87 = arith.truncf %86 : vector<48x32xf32> to vector<48x32xbf16>
    %c0_30 = arith.constant 0 : index
    %c0_31 = arith.constant 0 : index
    %88 = vector.load %arg8[%c0_30, %c0_31] : memref<32x64xbf16, #tpu.memory_space<vmem>>, vector<32x64xbf16>
    %cst_32 = arith.constant dense<0.000000e+00> : vector<48x64xf32>
    %89 = tpu.matmul %87, %88, %cst_32 {dimension_numbers = #tpu.dot_dimension_numbers<[1], [0], [0], [1], [0, 0, 1, 1], [], []>} : vector<48x32xbf16>, vector<32x64xbf16>, vector<48x64xf32> -> vector<48x64xf32>
    %c0_33 = arith.constant 0 : index
    %c0_34 = arith.constant 0 : index
    %90 = vector.load %arg9[%c0_33, %c0_34] : memref<1x64xf32, #tpu.memory_space<vmem>>, vector<1x64xf32>
    %91 = vector.broadcast %90 : vector<1x64xf32> to vector<48x64xf32>
    %92 = arith.addf %89, %91 : vector<48x64xf32>
    %93 = arith.mulf %92, %92 : vector<48x64xf32>
    %94 = arith.mulf %92, %93 : vector<48x64xf32>
    %cst_35 = arith.constant 4.471500e-02 : f32
    %95 = vector.broadcast %cst_35 : f32 to vector<48x64xf32>
    %96 = arith.mulf %95, %94 : vector<48x64xf32>
    %97 = arith.addf %92, %96 : vector<48x64xf32>
    %cst_36 = arith.constant 0.797884583 : f32
    %98 = vector.broadcast %cst_36 : f32 to vector<48x64xf32>
    %99 = arith.mulf %98, %97 : vector<48x64xf32>
    %100 = math.tanh %99 : vector<48x64xf32>
    %cst_37 = arith.constant 1.000000e+00 : f32
    %101 = vector.broadcast %cst_37 : f32 to vector<48x64xf32>
    %102 = arith.addf %101, %100 : vector<48x64xf32>
    %cst_38 = arith.constant 5.000000e-01 : f32
    %103 = vector.broadcast %cst_38 : f32 to vector<48x64xf32>
    %104 = arith.mulf %103, %102 : vector<48x64xf32>
    %105 = arith.mulf %92, %104 : vector<48x64xf32>
    %106 = arith.truncf %105 : vector<48x64xf32> to vector<48x64xbf16>
    %c0_39 = arith.constant 0 : index
    %c0_40 = arith.constant 0 : index
    %107 = vector.load %arg10[%c0_39, %c0_40] : memref<64x32xbf16, #tpu.memory_space<vmem>>, vector<64x32xbf16>
    %cst_41 = arith.constant dense<0.000000e+00> : vector<48x32xf32>
    %108 = tpu.matmul %106, %107, %cst_41 {dimension_numbers = #tpu.dot_dimension_numbers<[1], [0], [0], [1], [0, 0, 1, 1], [], []>} : vector<48x64xbf16>, vector<64x32xbf16>, vector<48x32xf32> -> vector<48x32xf32>
    %c0_42 = arith.constant 0 : index
    %c0_43 = arith.constant 0 : index
    %109 = vector.load %arg11[%c0_42, %c0_43] : memref<1x32xf32, #tpu.memory_space<vmem>>, vector<1x32xf32>
    %110 = vector.broadcast %109 : vector<1x32xf32> to vector<48x32xf32>
    %111 = arith.addf %108, %110 : vector<48x32xf32>
    %112 = arith.addf %111, %86 : vector<48x32xf32>
    %c0_44 = arith.constant 0 : index
    %c0_45 = arith.constant 0 : index
    %113 = vector.load %arg12[%c0_44, %c0_45] : memref<1x32xf32, #tpu.memory_space<vmem>>, vector<1x32xf32>
    %c0_46 = arith.constant 0 : index
    %c0_47 = arith.constant 0 : index
    %114 = vector.load %arg13[%c0_46, %c0_47] : memref<1x32xf32, #tpu.memory_space<vmem>>, vector<1x32xf32>
    %cst_48 = arith.constant dense<0.000000e+00> : vector<48xf32>
    %115 = vector.multi_reduction <add>, %112, %cst_48 [1] : vector<48x32xf32> to vector<48xf32>
    %116 = vector.shape_cast %115 : vector<48xf32> to vector<48x1xf32>
    %cst_49 = arith.constant 3.200000e+01 : f32
    %117 = vector.broadcast %cst_49 : f32 to vector<48x1xf32>
    %118 = arith.divf %116, %117 : vector<48x1xf32>
    %119 = vector.broadcast %118 : vector<48x1xf32> to vector<48x32xf32>
    %120 = arith.subf %112, %119 : vector<48x32xf32>
    %121 = arith.mulf %120, %120 : vector<48x32xf32>
    %cst_50 = arith.constant dense<0.000000e+00> : vector<48xf32>
    %122 = vector.multi_reduction <add>, %121, %cst_50 [1] : vector<48x32xf32> to vector<48xf32>
    %123 = vector.shape_cast %122 : vector<48xf32> to vector<48x1xf32>
    %cst_51 = arith.constant 3.200000e+01 : f32
    %124 = vector.broadcast %cst_51 : f32 to vector<48x1xf32>
    %125 = arith.divf %123, %124 : vector<48x1xf32>
    %cst_52 = arith.constant 9.99999996E-13 : f32
    %126 = vector.broadcast %cst_52 : f32 to vector<48x1xf32>
    %127 = arith.addf %125, %126 : vector<48x1xf32>
    %128 = math.rsqrt %127 : vector<48x1xf32>
    %129 = vector.broadcast %128 : vector<48x1xf32> to vector<48x32xf32>
    %130 = arith.mulf %120, %129 : vector<48x32xf32>
    %131 = vector.broadcast %113 : vector<1x32xf32> to vector<48x32xf32>
    %132 = arith.mulf %130, %131 : vector<48x32xf32>
    %133 = vector.broadcast %114 : vector<1x32xf32> to vector<48x32xf32>
    %134 = arith.addf %132, %133 : vector<48x32xf32>
    %c0_53 = arith.constant 0 : index
    %c0_54 = arith.constant 0 : index
    %135 = vector.load %arg14[%c0_53, %c0_54] : memref<48x32xf32, #tpu.memory_space<vmem>>, vector<48x32xf32>
    tpu.vector_store %arg14[%c0_53, %c0_54], %134 {strides = array<i32>} : memref<48x32xf32, #tpu.memory_space<vmem>>, vector<48x32xf32>,
    return
  }
}

module attributes {stable_mosaic.version = 11 : i64} {
  func.func @_masked_mean_kernel(%arg0: memref<6x8x32xf32, #tpu.memory_space<vmem>>, %arg1: memref<6x8x1xf32, #tpu.memory_space<vmem>>, %arg2: memref<6x32xf32, #tpu.memory_space<vmem>>) attributes {dimension_semantics = [], scalar_prefetch = 0 : i64, scratch_operands = 0 : i64, tpu.core_type = #tpu.core_type<tc>} {
    %c0 = arith.constant 0 : index
    %c0_0 = arith.constant 0 : index
    %c0_1 = arith.constant 0 : index
    %0 = vector.load %arg0[%c0, %c0_0, %c0_1] : memref<6x8x32xf32, #tpu.memory_space<vmem>>, vector<6x8x32xf32>
    %c0_2 = arith.constant 0 : index
    %c0_3 = arith.constant 0 : index
    %c0_4 = arith.constant 0 : index
    %1 = vector.load %arg1[%c0_2, %c0_3, %c0_4] : memref<6x8x1xf32, #tpu.memory_space<vmem>>, vector<6x8x1xf32>
    %2 = vector.broadcast %1 : vector<6x8x1xf32> to vector<6x8x32xf32>
    %3 = arith.mulf %0, %2 : vector<6x8x32xf32>
    %cst = arith.constant dense<0.000000e+00> : vector<6x32xf32>
    %4 = vector.multi_reduction <add>, %3, %cst [1] : vector<6x8x32xf32> to vector<6x32xf32>
    %cst_5 = arith.constant dense<0.000000e+00> : vector<6x1xf32>
    %5 = vector.multi_reduction <add>, %1, %cst_5 [1] : vector<6x8x1xf32> to vector<6x1xf32>
    %cst_6 = arith.constant 1.000000e+00 : f32
    %6 = vector.broadcast %cst_6 : f32 to vector<6x1xf32>
    %7 = arith.maximumf %5, %6 : vector<6x1xf32>
    %8 = vector.broadcast %7 : vector<6x1xf32> to vector<6x32xf32>
    %9 = arith.divf %4, %8 : vector<6x32xf32>
    %c0_7 = arith.constant 0 : index
    %c0_8 = arith.constant 0 : index
    %10 = vector.load %arg2[%c0_7, %c0_8] : memref<6x32xf32, #tpu.memory_space<vmem>>, vector<6x32xf32>
    tpu.vector_store %arg2[%c0_7, %c0_8], %9 {strides = array<i32>} : memref<6x32xf32, #tpu.memory_space<vmem>>, vector<6x32xf32>,
    return
  }
}

module attributes {stable_mosaic.version = 11 : i64} {
  func.func @_gru_head_kernel(%arg0: memref<3x2x32xf32, #tpu.memory_space<vmem>>, %arg1: memref<3x2x1xf32, #tpu.memory_space<vmem>>, %arg2: memref<32x48xbf16, #tpu.memory_space<vmem>>, %arg3: memref<16x48xf32, #tpu.memory_space<vmem>>, %arg4: memref<1x48xf32, #tpu.memory_space<vmem>>, %arg5: memref<1x48xf32, #tpu.memory_space<vmem>>, %arg6: memref<16x16xf32, #tpu.memory_space<vmem>>, %arg7: memref<1x16xf32, #tpu.memory_space<vmem>>, %arg8: memref<16x1xf32, #tpu.memory_space<vmem>>, %arg9: memref<1x1xf32, #tpu.memory_space<vmem>>, %arg10: memref<2x1xf32, #tpu.memory_space<vmem>>, %arg11: memref<3x2x48xf32, #tpu.memory_space<vmem>>) attributes {dimension_semantics = [], scalar_prefetch = 0 : i64, scratch_operands = 1 : i64, tpu.core_type = #tpu.core_type<tc>} {
    %c0 = arith.constant 0 : index
    %c0_0 = arith.constant 0 : index
    %c0_1 = arith.constant 0 : index
    %0 = vector.load %arg0[%c0, %c0_0, %c0_1] : memref<3x2x32xf32, #tpu.memory_space<vmem>>, vector<3x2x32xf32>
    %1 = vector.shape_cast %0 : vector<3x2x32xf32> to vector<6x32xf32>
    %2 = arith.truncf %1 : vector<6x32xf32> to vector<6x32xbf16>
    %c0_2 = arith.constant 0 : index
    %c0_3 = arith.constant 0 : index
    %3 = vector.load %arg2[%c0_2, %c0_3] : memref<32x48xbf16, #tpu.memory_space<vmem>>, vector<32x48xbf16>
    %cst = arith.constant dense<0.000000e+00> : vector<6x48xf32>
    %4 = tpu.matmul %2, %3, %cst {dimension_numbers = #tpu.dot_dimension_numbers<[1], [0], [0], [1], [0, 0, 1, 1], [], []>} : vector<6x32xbf16>, vector<32x48xbf16>, vector<6x48xf32> -> vector<6x48xf32>
    %c0_4 = arith.constant 0 : index
    %c0_5 = arith.constant 0 : index
    %5 = vector.load %arg4[%c0_4, %c0_5] : memref<1x48xf32, #tpu.memory_space<vmem>>, vector<1x48xf32>
    %6 = vector.broadcast %5 : vector<1x48xf32> to vector<6x48xf32>
    %7 = arith.addf %4, %6 : vector<6x48xf32>
    %8 = vector.shape_cast %7 : vector<6x48xf32> to vector<3x2x48xf32>
    %c0_6 = arith.constant 0 : index
    %c0_7 = arith.constant 0 : index
    %c0_8 = arith.constant 0 : index
    %9 = vector.load %arg11[%c0_6, %c0_7, %c0_8] : memref<3x2x48xf32, #tpu.memory_space<vmem>>, vector<3x2x48xf32>
    tpu.vector_store %arg11[%c0_6, %c0_7, %c0_8], %8 {strides = array<i32>} : memref<3x2x48xf32, #tpu.memory_space<vmem>>, vector<3x2x48xf32>,
    %c0_9 = arith.constant 0 : index
    %c0_10 = arith.constant 0 : index
    %10 = vector.load %arg3[%c0_9, %c0_10] : memref<16x48xf32, #tpu.memory_space<vmem>>, vector<16x48xf32>
    %c0_11 = arith.constant 0 : index
    %c0_12 = arith.constant 0 : index
    %11 = vector.load %arg5[%c0_11, %c0_12] : memref<1x48xf32, #tpu.memory_space<vmem>>, vector<1x48xf32>
    %cst_13 = arith.constant 0.000000e+00 : f32
    %12 = vector.broadcast %cst_13 : f32 to vector<2x16xf32>
    %c0_i32 = arith.constant 0 : i32
    %13 = arith.index_cast %c0_i32 : i32 to index
    %c0_14 = arith.constant 0 : index
    %c0_15 = arith.constant 0 : index
    %14 = vector.load %arg11[%13, %c0_14, %c0_15] : memref<3x2x48xf32, #tpu.memory_space<vmem>>, vector<1x2x48xf32>
    %15 = vector.shape_cast %14 : vector<1x2x48xf32> to vector<2x48xf32>
    %16 = arith.index_cast %c0_i32 : i32 to index
    %c0_16 = arith.constant 0 : index
    %c0_17 = arith.constant 0 : index
    %17 = vector.load %arg1[%16, %c0_16, %c0_17] : memref<3x2x1xf32, #tpu.memory_space<vmem>>, vector<1x2x1xf32>
    %18 = vector.shape_cast %17 : vector<1x2x1xf32> to vector<2x1xf32>
    %cst_18 = arith.constant dense<0.000000e+00> : vector<2x48xf32>
    %19 = tpu.matmul %12, %10, %cst_18 {dimension_numbers = #tpu.dot_dimension_numbers<[1], [0], [0], [1], [0, 0, 1, 1], [], []>} : vector<2x16xf32>, vector<16x48xf32>, vector<2x48xf32> -> vector<2x48xf32>
    %20 = vector.broadcast %11 : vector<1x48xf32> to vector<2x48xf32>
    %21 = arith.addf %19, %20 : vector<2x48xf32>
    %22 = vector.extract_strided_slice %15 {offsets = [0, 0], sizes = [2, 16], strides = [1, 1]} : vector<2x48xf32> to vector<2x16xf32>
    %23 = vector.extract_strided_slice %21 {offsets = [0, 0], sizes = [2, 16], strides = [1, 1]} : vector<2x48xf32> to vector<2x16xf32>
    %24 = arith.addf %22, %23 : vector<2x16xf32>
    %25 = arith.negf %24 : vector<2x16xf32>
    %26 = math.exp %25 : vector<2x16xf32>
    %cst_19 = arith.constant 1.000000e+00 : f32
    %27 = vector.broadcast %cst_19 : f32 to vector<2x16xf32>
    %28 = arith.addf %27, %26 : vector<2x16xf32>
    %29 = arith.divf %27, %28 : vector<2x16xf32>
    %30 = vector.extract_strided_slice %15 {offsets = [0, 16], sizes = [2, 16], strides = [1, 1]} : vector<2x48xf32> to vector<2x16xf32>
    %31 = vector.extract_strided_slice %21 {offsets = [0, 16], sizes = [2, 16], strides = [1, 1]} : vector<2x48xf32> to vector<2x16xf32>
    %32 = arith.addf %30, %31 : vector<2x16xf32>
    %33 = arith.negf %32 : vector<2x16xf32>
    %34 = math.exp %33 : vector<2x16xf32>
    %cst_20 = arith.constant 1.000000e+00 : f32
    %35 = vector.broadcast %cst_20 : f32 to vector<2x16xf32>
    %36 = arith.addf %35, %34 : vector<2x16xf32>
    %37 = arith.divf %35, %36 : vector<2x16xf32>
    %38 = vector.extract_strided_slice %15 {offsets = [0, 32], sizes = [2, 16], strides = [1, 1]} : vector<2x48xf32> to vector<2x16xf32>
    %39 = vector.extract_strided_slice %21 {offsets = [0, 32], sizes = [2, 16], strides = [1, 1]} : vector<2x48xf32> to vector<2x16xf32>
    %40 = arith.mulf %29, %39 : vector<2x16xf32>
    %41 = arith.addf %38, %40 : vector<2x16xf32>
    %42 = math.tanh %41 : vector<2x16xf32>
    %cst_21 = arith.constant 1.000000e+00 : f32
    %43 = vector.broadcast %cst_21 : f32 to vector<2x16xf32>
    %44 = arith.subf %43, %37 : vector<2x16xf32>
    %45 = arith.mulf %44, %42 : vector<2x16xf32>
    %46 = arith.mulf %37, %12 : vector<2x16xf32>
    %47 = arith.addf %45, %46 : vector<2x16xf32>
    %48 = vector.broadcast %18 : vector<2x1xf32> to vector<2x16xf32>
    %49 = arith.mulf %48, %47 : vector<2x16xf32>
    %cst_22 = arith.constant 1.000000e+00 : f32
    %50 = vector.broadcast %cst_22 : f32 to vector<2x1xf32>
    %51 = arith.subf %50, %18 : vector<2x1xf32>
    %52 = vector.broadcast %51 : vector<2x1xf32> to vector<2x16xf32>
    %53 = arith.mulf %52, %12 : vector<2x16xf32>
    %54 = arith.addf %49, %53 : vector<2x16xf32>
    %c1_i32 = arith.constant 1 : i32
    %55 = arith.index_cast %c1_i32 : i32 to index
    %c0_23 = arith.constant 0 : index
    %c0_24 = arith.constant 0 : index
    %56 = vector.load %arg11[%55, %c0_23, %c0_24] : memref<3x2x48xf32, #tpu.memory_space<vmem>>, vector<1x2x48xf32>
    %57 = vector.shape_cast %56 : vector<1x2x48xf32> to vector<2x48xf32>
    %58 = arith.index_cast %c1_i32 : i32 to index
    %c0_25 = arith.constant 0 : index
    %c0_26 = arith.constant 0 : index
    %59 = vector.load %arg1[%58, %c0_25, %c0_26] : memref<3x2x1xf32, #tpu.memory_space<vmem>>, vector<1x2x1xf32>
    %60 = vector.shape_cast %59 : vector<1x2x1xf32> to vector<2x1xf32>
    %cst_27 = arith.constant dense<0.000000e+00> : vector<2x48xf32>
    %61 = tpu.matmul %54, %10, %cst_27 {dimension_numbers = #tpu.dot_dimension_numbers<[1], [0], [0], [1], [0, 0, 1, 1], [], []>} : vector<2x16xf32>, vector<16x48xf32>, vector<2x48xf32> -> vector<2x48xf32>
    %62 = vector.broadcast %11 : vector<1x48xf32> to vector<2x48xf32>
    %63 = arith.addf %61, %62 : vector<2x48xf32>
    %64 = vector.extract_strided_slice %57 {offsets = [0, 0], sizes = [2, 16], strides = [1, 1]} : vector<2x48xf32> to vector<2x16xf32>
    %65 = vector.extract_strided_slice %63 {offsets = [0, 0], sizes = [2, 16], strides = [1, 1]} : vector<2x48xf32> to vector<2x16xf32>
    %66 = arith.addf %64, %65 : vector<2x16xf32>
    %67 = arith.negf %66 : vector<2x16xf32>
    %68 = math.exp %67 : vector<2x16xf32>
    %cst_28 = arith.constant 1.000000e+00 : f32
    %69 = vector.broadcast %cst_28 : f32 to vector<2x16xf32>
    %70 = arith.addf %69, %68 : vector<2x16xf32>
    %71 = arith.divf %69, %70 : vector<2x16xf32>
    %72 = vector.extract_strided_slice %57 {offsets = [0, 16], sizes = [2, 16], strides = [1, 1]} : vector<2x48xf32> to vector<2x16xf32>
    %73 = vector.extract_strided_slice %63 {offsets = [0, 16], sizes = [2, 16], strides = [1, 1]} : vector<2x48xf32> to vector<2x16xf32>
    %74 = arith.addf %72, %73 : vector<2x16xf32>
    %75 = arith.negf %74 : vector<2x16xf32>
    %76 = math.exp %75 : vector<2x16xf32>
    %cst_29 = arith.constant 1.000000e+00 : f32
    %77 = vector.broadcast %cst_29 : f32 to vector<2x16xf32>
    %78 = arith.addf %77, %76 : vector<2x16xf32>
    %79 = arith.divf %77, %78 : vector<2x16xf32>
    %80 = vector.extract_strided_slice %57 {offsets = [0, 32], sizes = [2, 16], strides = [1, 1]} : vector<2x48xf32> to vector<2x16xf32>
    %81 = vector.extract_strided_slice %63 {offsets = [0, 32], sizes = [2, 16], strides = [1, 1]} : vector<2x48xf32> to vector<2x16xf32>
    %82 = arith.mulf %71, %81 : vector<2x16xf32>
    %83 = arith.addf %80, %82 : vector<2x16xf32>
    %84 = math.tanh %83 : vector<2x16xf32>
    %cst_30 = arith.constant 1.000000e+00 : f32
    %85 = vector.broadcast %cst_30 : f32 to vector<2x16xf32>
    %86 = arith.subf %85, %79 : vector<2x16xf32>
    %87 = arith.mulf %86, %84 : vector<2x16xf32>
    %88 = arith.mulf %79, %54 : vector<2x16xf32>
    %89 = arith.addf %87, %88 : vector<2x16xf32>
    %90 = vector.broadcast %60 : vector<2x1xf32> to vector<2x16xf32>
    %91 = arith.mulf %90, %89 : vector<2x16xf32>
    %cst_31 = arith.constant 1.000000e+00 : f32
    %92 = vector.broadcast %cst_31 : f32 to vector<2x1xf32>
    %93 = arith.subf %92, %60 : vector<2x1xf32>
    %94 = vector.broadcast %93 : vector<2x1xf32> to vector<2x16xf32>
    %95 = arith.mulf %94, %54 : vector<2x16xf32>
    %96 = arith.addf %91, %95 : vector<2x16xf32>
    %c2_i32 = arith.constant 2 : i32
    %97 = arith.index_cast %c2_i32 : i32 to index
    %c0_32 = arith.constant 0 : index
    %c0_33 = arith.constant 0 : index
    %98 = vector.load %arg11[%97, %c0_32, %c0_33] : memref<3x2x48xf32, #tpu.memory_space<vmem>>, vector<1x2x48xf32>
    %99 = vector.shape_cast %98 : vector<1x2x48xf32> to vector<2x48xf32>
    %100 = arith.index_cast %c2_i32 : i32 to index
    %c0_34 = arith.constant 0 : index
    %c0_35 = arith.constant 0 : index
    %101 = vector.load %arg1[%100, %c0_34, %c0_35] : memref<3x2x1xf32, #tpu.memory_space<vmem>>, vector<1x2x1xf32>
    %102 = vector.shape_cast %101 : vector<1x2x1xf32> to vector<2x1xf32>
    %cst_36 = arith.constant dense<0.000000e+00> : vector<2x48xf32>
    %103 = tpu.matmul %96, %10, %cst_36 {dimension_numbers = #tpu.dot_dimension_numbers<[1], [0], [0], [1], [0, 0, 1, 1], [], []>} : vector<2x16xf32>, vector<16x48xf32>, vector<2x48xf32> -> vector<2x48xf32>
    %104 = vector.broadcast %11 : vector<1x48xf32> to vector<2x48xf32>
    %105 = arith.addf %103, %104 : vector<2x48xf32>
    %106 = vector.extract_strided_slice %99 {offsets = [0, 0], sizes = [2, 16], strides = [1, 1]} : vector<2x48xf32> to vector<2x16xf32>
    %107 = vector.extract_strided_slice %105 {offsets = [0, 0], sizes = [2, 16], strides = [1, 1]} : vector<2x48xf32> to vector<2x16xf32>
    %108 = arith.addf %106, %107 : vector<2x16xf32>
    %109 = arith.negf %108 : vector<2x16xf32>
    %110 = math.exp %109 : vector<2x16xf32>
    %cst_37 = arith.constant 1.000000e+00 : f32
    %111 = vector.broadcast %cst_37 : f32 to vector<2x16xf32>
    %112 = arith.addf %111, %110 : vector<2x16xf32>
    %113 = arith.divf %111, %112 : vector<2x16xf32>
    %114 = vector.extract_strided_slice %99 {offsets = [0, 16], sizes = [2, 16], strides = [1, 1]} : vector<2x48xf32> to vector<2x16xf32>
    %115 = vector.extract_strided_slice %105 {offsets = [0, 16], sizes = [2, 16], strides = [1, 1]} : vector<2x48xf32> to vector<2x16xf32>
    %116 = arith.addf %114, %115 : vector<2x16xf32>
    %117 = arith.negf %116 : vector<2x16xf32>
    %118 = math.exp %117 : vector<2x16xf32>
    %cst_38 = arith.constant 1.000000e+00 : f32
    %119 = vector.broadcast %cst_38 : f32 to vector<2x16xf32>
    %120 = arith.addf %119, %118 : vector<2x16xf32>
    %121 = arith.divf %119, %120 : vector<2x16xf32>
    %122 = vector.extract_strided_slice %99 {offsets = [0, 32], sizes = [2, 16], strides = [1, 1]} : vector<2x48xf32> to vector<2x16xf32>
    %123 = vector.extract_strided_slice %105 {offsets = [0, 32], sizes = [2, 16], strides = [1, 1]} : vector<2x48xf32> to vector<2x16xf32>
    %124 = arith.mulf %113, %123 : vector<2x16xf32>
    %125 = arith.addf %122, %124 : vector<2x16xf32>
    %126 = math.tanh %125 : vector<2x16xf32>
    %cst_39 = arith.constant 1.000000e+00 : f32
    %127 = vector.broadcast %cst_39 : f32 to vector<2x16xf32>
    %128 = arith.subf %127, %121 : vector<2x16xf32>
    %129 = arith.mulf %128, %126 : vector<2x16xf32>
    %130 = arith.mulf %121, %96 : vector<2x16xf32>
    %131 = arith.addf %129, %130 : vector<2x16xf32>
    %132 = vector.broadcast %102 : vector<2x1xf32> to vector<2x16xf32>
    %133 = arith.mulf %132, %131 : vector<2x16xf32>
    %cst_40 = arith.constant 1.000000e+00 : f32
    %134 = vector.broadcast %cst_40 : f32 to vector<2x1xf32>
    %135 = arith.subf %134, %102 : vector<2x1xf32>
    %136 = vector.broadcast %135 : vector<2x1xf32> to vector<2x16xf32>
    %137 = arith.mulf %136, %96 : vector<2x16xf32>
    %138 = arith.addf %133, %137 : vector<2x16xf32>
    %c3_i32 = arith.constant 3 : i32
    %c0_41 = arith.constant 0 : index
    %c0_42 = arith.constant 0 : index
    %139 = vector.load %arg6[%c0_41, %c0_42] : memref<16x16xf32, #tpu.memory_space<vmem>>, vector<16x16xf32>
    %cst_43 = arith.constant dense<0.000000e+00> : vector<2x16xf32>
    %140 = tpu.matmul %138, %139, %cst_43 {dimension_numbers = #tpu.dot_dimension_numbers<[1], [0], [0], [1], [0, 0, 1, 1], [], []>} : vector<2x16xf32>, vector<16x16xf32>, vector<2x16xf32> -> vector<2x16xf32>
    %c0_44 = arith.constant 0 : index
    %c0_45 = arith.constant 0 : index
    %141 = vector.load %arg7[%c0_44, %c0_45] : memref<1x16xf32, #tpu.memory_space<vmem>>, vector<1x16xf32>
    %142 = vector.broadcast %141 : vector<1x16xf32> to vector<2x16xf32>
    %143 = arith.addf %140, %142 : vector<2x16xf32>
    %cst_46 = arith.constant 0.000000e+00 : f32
    %144 = vector.broadcast %cst_46 : f32 to vector<2x16xf32>
    %145 = arith.maximumf %143, %144 : vector<2x16xf32>
    %c0_47 = arith.constant 0 : index
    %c0_48 = arith.constant 0 : index
    %146 = vector.load %arg8[%c0_47, %c0_48] : memref<16x1xf32, #tpu.memory_space<vmem>>, vector<16x1xf32>
    %cst_49 = arith.constant dense<0.000000e+00> : vector<2x1xf32>
    %147 = tpu.matmul %145, %146, %cst_49 {dimension_numbers = #tpu.dot_dimension_numbers<[1], [0], [0], [1], [0, 0, 1, 1], [], []>} : vector<2x16xf32>, vector<16x1xf32>, vector<2x1xf32> -> vector<2x1xf32>
    %c0_50 = arith.constant 0 : index
    %c0_51 = arith.constant 0 : index
    %148 = vector.load %arg9[%c0_50, %c0_51] : memref<1x1xf32, #tpu.memory_space<vmem>>, vector<1x1xf32>
    %149 = vector.broadcast %148 : vector<1x1xf32> to vector<2x1xf32>
    %150 = arith.addf %147, %149 : vector<2x1xf32>
    %c0_52 = arith.constant 0 : index
    %c0_53 = arith.constant 0 : index
    %151 = vector.load %arg10[%c0_52, %c0_53] : memref<2x1xf32, #tpu.memory_space<vmem>>, vector<2x1xf32>
    tpu.vector_store %arg10[%c0_52, %c0_53], %150 {strides = array<i32>} : memref<2x1xf32, #tpu.memory_space<vmem>>, vector<2x1xf32>,
    return
  }
}

</mosaic_0001>

<bundles_post_ra>
// kernel: _lambda_.5
= control target key start
LH: loop header
LB: loop body
LE: loop exit
PB: predicated region body
PF: predicated region fallthrough
CT: control target
= control target key end

     0   :  { %vm22_vm0 = vcmask 261120   ;;  %s245_s0 = inlined_call_operand.vmem [shape: f32[48,32], index: 0, kind: input, shape index: {}]   ;;  %s246_s1 = inlined_call_operand.vmem [shape: f32[1,32], index: 1, kind: input, shape index: {}]   ;;  %s247_s2 = inlined_call_operand.vmem [shape: f32[1,32], index: 2, kind: input, shape index: {}]   ;;  %s248_s3 = inlined_call_operand.vmem [shape: f32[48,32], index: 3, kind: output, shape index: {}]  }
   0x1   :  { %v14_v0 = vld [vmem:[%s245_s0] sm:$0xff]  ;;  %v16_v1 = vld [vmem:[%s245_s0 + $0x10] sm:$0xff]  ;;  %v15_v2 = vld [vmem:[%s245_s0 + $0x8] sm:$0xff] }
   0x2   :  { %v23_v3 = vsel %vm22_vm0, %v14_v0, 0.0  ;;  %v29_v4 = vsel %vm22_vm0, %v16_v1, 0.0  ;;  %v17_v5 = vld [vmem:[%s245_s0 + $0x18] sm:$0xff]  ;;  %v26_v6 = vsel %vm22_vm0, %v15_v2, 0.0  ;;  %v18_v8 = vld [vmem:[%s245_s0 + $0x20] sm:$0xff]  ;;  %v19_v9 = vld [vmem:[%s245_s0 + $0x28] sm:$0xff] }
   0x3   :  { %24 = vadd.xlane.f32.xlu0 %v23_v3  ;;  %30 = vadd.xlane.f32.xlu1 %v29_v4  ;;  %v32_v7 = vsel %vm22_vm0, %v17_v5, 0.0  ;;  %v35_v10 = vsel %vm22_vm0, %v18_v8, 0.0  ;;  %v38_v11 = vsel %vm22_vm0, %v19_v9, 0.0  ;;  %v136_v60 = vld [vmem:[%s246_s1] ss:$0 sm:$0xff] }
   0x4   :  { %v137_v63 = vld [vmem:[%s247_s2] ss:$0 sm:$0xff] }
   0x7   :  { %27 = vadd.xlane.f32.xlu0 %v26_v6  ;;  %33 = vadd.xlane.f32.xlu1 %v32_v7 }
   0xb   :  { %36 = vadd.xlane.f32.xlu0 %v35_v10  ;;  %39 = vadd.xlane.f32.xlu1 %v38_v11 }
  0x90   :  { %v25_v12 = vpop.xlane.xlu0 %24  ;;  %v31_v13 = vpop.xlane.xlu1 %30 }
  0x91   :  { %v42_v14 = vmul.f32 0.03125, %v25_v12  ;;  %v44_v15 = vmul.f32 0.03125, %v31_v13 }
  0x93   :  { %v48_v16 = vsub.f32 %v14_v0, %v42_v14  ;;  %v194_v17 = vsub.f32 %v16_v1, %v44_v15 }
  0x94   :  { %v28_v18 = vpop.xlane.xlu0 %27  ;;  %v34_v19 = vpop.xlane.xlu1 %33 }
  0x95   :  { %v43_v20 = vmul.f32 0.03125, %v28_v18  ;;  %v45_v21 = vmul.f32 0.03125, %v34_v19  ;;  %v54_v22 = vmul.f32 %v48_v16, %v48_v16  ;;  %v56_v23 = vmul.f32 %v194_v17, %v194_v17 }
  0x97   :  { %v49_v24 = vsub.f32 %v15_v2, %v43_v20  ;;  %v198_v25 = vsub.f32 %v17_v5, %v45_v21  ;;  %v60_v26 = vsel %vm22_vm0, %v54_v22, 0.0  ;;  %v66_v29 = vsel %vm22_vm0, %v56_v23, 0.0 }
  0x98   :  { %61 = vadd.xlane.f32.xlu0 %v60_v26  ;;  %v37_v27 = vpop.xlane.xlu0 %36  ;;  %v40_v28 = vpop.xlane.xlu1 %39 }
  0x99   :  { %v46_v30 = vmul.f32 0.03125, %v37_v27  ;;  %v47_v31 = vmul.f32 0.03125, %v40_v28  ;;  %v55_v32 = vmul.f32 %v49_v24, %v49_v24  ;;  %v57_v33 = vmul.f32 %v198_v25, %v198_v25 }
  0x9b   :  { %v52_v34 = vsub.f32 %v18_v8, %v46_v30  ;;  %v204_v35 = vsub.f32 %v19_v9, %v47_v31  ;;  %v63_v36 = vsel %vm22_vm0, %v55_v32, 0.0  ;;  %v69_v37 = vsel %vm22_vm0, %v57_v33, 0.0 }
  0x9c   :  { %67 = vadd.xlane.f32.xlu0 %v66_v29  ;;  %64 = vadd.xlane.f32.xlu1 %v63_v36 }
  0x9d   :  { %v58_v38 = vmul.f32 %v52_v34, %v52_v34  ;;  %v59_v39 = vmul.f32 %v204_v35, %v204_v35 }
  0x9f   :  { %v72_v40 = vsel %vm22_vm0, %v58_v38, 0.0  ;;  %v75_v41 = vsel %vm22_vm0, %v59_v39, 0.0 }
  0xa0   :  { %70 = vadd.xlane.f32.xlu1 %v69_v37  ;;  %73 = vadd.xlane.f32.xlu0 %v72_v40 }
  0xa4   :  { %76 = vadd.xlane.f32.xlu1 %v75_v41 }
 0x125   :  { %v62_v42 = vpop.xlane.xlu0 %61 }
 0x126   :  { %v78_v43 = vmul.f32 0.03125, %v62_v42 }
 0x128   :  { %v84_v44 = vadd.f32 1e-12, %v78_v43 }
 0x129   :  { %v65_v45 = vpop.xlane.xlu1 %64  ;;  %v68_v46 = vpop.xlane.xlu0 %67 }
 0x12a   :  { %138 = vrsqrt.f32 %v84_v44  ;;  %v79_v47 = vmul.f32 0.03125, %v65_v45  ;;  %v80_v48 = vmul.f32 0.03125, %v68_v46 }
 0x12c   :  { %v85_v49 = vadd.f32 1e-12, %v79_v47  ;;  %v86_v50 = vadd.f32 1e-12, %v80_v48 }
 0x12d   :  { %v71_v51 = vpop.xlane.xlu1 %70  ;;  %v74_v52 = vpop.xlane.xlu0 %73 }
 0x12e   :  { %140 = vrsqrt.f32 %v85_v49  ;;  %v81_v53 = vmul.f32 0.03125, %v71_v51  ;;  %v82_v54 = vmul.f32 0.03125, %v74_v52 }
 0x12f   :  { %142 = vrsqrt.f32 %v86_v50 }
 0x130   :  { %v87_v55 = vadd.f32 1e-12, %v81_v53  ;;  %v88_v56 = vadd.f32 1e-12, %v82_v54 }
 0x131   :  { %v77_v57 = vpop.xlane.xlu1 %76 }
 0x132   :  { %144 = vrsqrt.f32 %v87_v55  ;;  %v83_v58 = vmul.f32 0.03125, %v77_v57 }
 0x133   :  { %146 = vrsqrt.f32 %v88_v56 }
 0x134   :  { %v139_v59 = vpop.eup %138  ;;  %v89_v61 = vadd.f32 1e-12, %v83_v58 }
 0x135   :  { %v96_v62 = vmul.f32 %v139_v59, %v48_v16 }
 0x136   :  { %148 = vrsqrt.f32 %v89_v61 }
 0x137   :  { %v108_v0 = vmul.f32 %v136_v60, %v96_v62 }
 0x138   :  { %v141_v1 = vpop.eup %140 }
 0x139   :  { %v143_v2 = vpop.eup %142  ;;  %v120_v3 = vadd.f32 %v137_v63, %v108_v0  ;;  %v97_v4 = vmul.f32 %v141_v1, %v49_v24 }
 0x13a   :  { %v98_v5 = vmul.f32 %v143_v2, %v194_v17 }
 0x13b   :  { %126 = vst.msk [vmem:[%s248_s3] sm:$0xff] %vm22_vm0, %v120_v3  ;;  %v109_v6 = vmul.f32 %v136_v60, %v97_v4 }
 0x13c   :  { %v145_v7 = vpop.eup %144  ;;  %v110_v8 = vmul.f32 %v136_v60, %v98_v5 }
 0x13d   :  { %v147_v9 = vpop.eup %146  ;;  %v121_v10 = vadd.f32 %v137_v63, %v109_v6  ;;  %v99_v11 = vmul.f32 %v145_v7, %v198_v25 }
 0x13e   :  { %v122_v12 = vadd.f32 %v137_v63, %v110_v8  ;;  %v100_v13 = vmul.f32 %v147_v9, %v52_v34 }
 0x13f   :  { %127 = vst.msk [vmem:[%s248_s3 + $0x8] sm:$0xff] %vm22_vm0, %v121_v10  ;;  %v111_v14 = vmul.f32 %v136_v60, %v99_v11 }
 0x140   :  { %v149_v15 = vpop.eup %148  ;;  %128 = vst.msk [vmem:[%s248_s3 + $0x10] sm:$0xff] %vm22_vm0, %v122_v12  ;;  %v112_v16 = vmul.f32 %v136_v60, %v100_v13 }
 0x141   :  { %v123_v17 = vadd.f32 %v137_v63, %v111_v14  ;;  %v101_v18 = vmul.f32 %v149_v15, %v204_v35 }
 0x142   :  { %v124_v19 = vadd.f32 %v137_v63, %v112_v16 }
 0x143   :  { %129 = vst.msk [vmem:[%s248_s3 + $0x18] sm:$0xff] %vm22_vm0, %v123_v17  ;;  %v113_v20 = vmul.f32 %v136_v60, %v101_v18 }
 0x144   :  { %130 = vst.msk [vmem:[%s248_s3 + $0x20] sm:$0xff] %vm22_vm0, %v124_v19 }
 0x145   :  { %v125_v21 = vadd.f32 %v137_v63, %v113_v20 }
 0x147   :  { %131 = vst.msk [vmem:[%s248_s3 + $0x28] sm:$0xff] %vm22_vm0, %v125_v21 }

// kernel: _lambda_.8
= control target key start
LH: loop header
LB: loop body
LE: loop exit
PB: predicated region body
PF: predicated region fallthrough
CT: control target
= control target key end

     0   :  { %vm102_vm0 = vcmask 7168   ;;  %v231_v0 = vmov 0   ;;  %vm59_vm1 = vcmask 261120   ;;  %vm199_vm2 = vcmask 1041409   ;;  %s298_s1 = inlined_call_operand.vmem [shape: f32[6,8,1], index: 1, kind: input, shape index: {}]   ;;  %s299_s0 = inlined_call_operand.vmem [shape: f32[6,8,32], index: 0, kind: input, shape index: {}]   ;;  %s300_s2 = inlined_call_operand.vmem [shape: f32[6,32], index: 2, kind: output, shape index: {}]  }
   0x1   :  { %218 = vset.pattern.permute.xlu1 %v231_v0  ;;  %217 = vset.pattern.permute.xlu0 %v231_v0  ;;  %v19_v1 = vld [vmem:[%s298_s1 + $0x10] sm:$0xff]  ;;  %v17_v2 = vld [vmem:[%s298_s1] sm:$0xff]  ;;  %v20_v3 = vld [vmem:[%s298_s1 + $0x18] sm:$0xff]  ;;  %vm201_vm3 = vcmask 1042434   ;;  %vm203_vm4 = vcmask 1043459   ;;  %vm205_vm5 = vcmask 1044484  }
   0x2   :  { %35 = vperm.xlu1 %218, %v19_v1   ;;  %v117_v4 = vsel %vm102_vm0, %v19_v1, 0.0  ;;  %25 = vperm.xlu0 %217, %v17_v2   ;;  %v103_v5 = vsel %vm102_vm0, %v17_v2, 0.0  ;;  %v124_v6 = vsel %vm102_vm0, %v20_v3, 0.0  ;;  %v18_v7 = vld [vmem:[%s298_s1 + $0x8] sm:$0xff]  ;;  %v21_v9 = vld [vmem:[%s298_s1 + $0x20] sm:$0xff]  ;;  %v13_v56 = vld [vmem:[%s299_s0 + $0x10] sm:$0xff] }
   0x3   :  { %v22_v8 = vld [vmem:[%s298_s1 + $0x28] sm:$0xff]  ;;  %v118_v10 = vrot.slane %v117_v4, 4  ;;  %v104_v11 = vrot.slane %v103_v5, 4  ;;  %v125_v12 = vrot.slane %v124_v6, 4  ;;  %v110_v13 = vsel %vm102_vm0, %v18_v7, 0.0  ;;  %v11_v55 = vld [vmem:[%s299_s0] sm:$0xff] }
   0x4   :  { %v111_v14 = vrot.slane %v110_v13, 4  ;;  %v138_v15 = vsel %vm102_vm0, %v22_v8, 0.0  ;;  %v131_v16 = vsel %vm102_vm0, %v21_v9, 0.0  ;;  %v14_v61 = vld [vmem:[%s299_s0 + $0x18] sm:$0xff]  ;;  %v12_v62 = vld [vmem:[%s299_s0 + $0x8] sm:$0xff]  ;;  %vm207_vm6 = vcmask 1045509  }
   0x5   :  { %v119_v17 = vadd.f32 %v118_v10, %v117_v4  ;;  %v105_v18 = vadd.f32 %v104_v11, %v103_v5  ;;  %v126_v19 = vadd.f32 %v125_v12, %v124_v6  ;;  %v139_v20 = vrot.slane %v138_v15, 4  ;;  %v16_v6 = vld [vmem:[%s299_s0 + $0x28] sm:$0xff] }
   0x6   :  { %40 = vperm.xlu1 %218, %v20_v3   ;;  %v112_v21 = vadd.f32 %v111_v14, %v110_v13  ;;  %30 = vperm.xlu0 %217, %v18_v7   ;;  %v132_v22 = vrot.slane %v131_v16, 4  ;;  %v15_v7 = vld [vmem:[%s299_s0 + $0x20] sm:$0xff]  ;;  %vm210_vm7 = vcmask 259072  }
   0x7   :  { %v120_v23 = vrot.slane %v119_v17, 2  ;;  %v106_v24 = vrot.slane %v105_v18, 2  ;;  %v127_v25 = vrot.slane %v126_v19, 2  ;;  %v140_v26 = vadd.f32 %v139_v20, %v138_v15 }
   0x8   :  { %v113_v27 = vrot.slane %v112_v21, 2  ;;  %v133_v28 = vadd.f32 %v132_v22, %v131_v16 }
   0x9   :  { %v121_v29 = vadd.f32 %v120_v23, %v119_v17  ;;  %v107_v30 = vadd.f32 %v106_v24, %v105_v18  ;;  %v128_v31 = vadd.f32 %v127_v25, %v126_v19  ;;  %v141_v32 = vrot.slane %v140_v26, 2 }
   0xa   :  { %v114_v33 = vadd.f32 %v113_v27, %v112_v21  ;;  %50 = vperm.xlu1 %218, %v22_v8   ;;  %v134_v34 = vrot.slane %v133_v28, 2  ;;  %45 = vperm.xlu0 %217, %v21_v9  }
   0xb   :  { %v142_v35 = vadd.f32 %v141_v32, %v140_v26  ;;  %v108_v36 = vrot.slane %v107_v30, 1  ;;  %v129_v37 = vrot.slane %v128_v31, 1  ;;  %v122_v38 = vrot.slane %v121_v29, 1 }
   0xc   :  { %v135_v39 = vadd.f32 %v134_v34, %v133_v28  ;;  %v115_v40 = vrot.slane %v114_v33, 1 }
   0xd   :  { %v109_v41 = vadd.f32 %v108_v36, %v107_v30  ;;  %v123_v42 = vadd.f32 %v122_v38, %v121_v29  ;;  %v130_v44 = vadd.f32 %v129_v37, %v128_v31  ;;  %v143_v45 = vrot.slane %v142_v35, 1 }
   0xe   :  { %v116_v43 = vadd.f32 %v115_v40, %v114_v33  ;;  %v136_v46 = vrot.slane %v135_v39, 1 }
   0xf   :  { %v145_v47 = vmax.f32 %v109_v41, 1.0  ;;  %v147_v49 = vmax.f32 %v123_v42, 1.0  ;;  %v148_v51 = vmax.f32 %v130_v44, 1.0  ;;  %v144_v52 = vadd.f32 %v143_v45, %v142_v35 }
  0x10   :  { %v146_v48 = vmax.f32 %v116_v43, 1.0  ;;  %v137_v50 = vadd.f32 %v136_v46, %v135_v39 }
  0x11   :  { %153 = vperm.xlu0 %217, %v145_v47   ;;  %v150_v54 = vmax.f32 %v144_v52, 1.0 }
  0x12   :  { %158 = vperm.xlu1 %218, %v146_v48   ;;  %v149_v53 = vmax.f32 %v137_v50, 1.0 }
  0x15   :  { %163 = vperm.xlu0 %217, %v147_v49  }
  0x16   :  { %168 = vperm.xlu1 %218, %v148_v51  }
  0x19   :  { %173 = vperm.xlu0 %217, %v149_v53  }
  0x1a   :  { %178 = vperm.xlu1 %218, %v150_v54  }
  0x81   :  { %v36_v57 = vpop.permute.xlu1 %35  ;;  %v26_v58 = vpop.permute.xlu0 %25 }
  0x82   :  { %v53_v59 = vmul.f32 %v26_v58, %v11_v55  ;;  %v55_v60 = vmul.f32 %v36_v57, %v13_v56 }
  0x84   :  { %v60_v63 = vsel %vm59_vm1, %v53_v59, 0.0  ;;  %v74_v4 = vsel %vm59_vm1, %v55_v60, 0.0 }
  0x85   :  { %v41_v0 = vpop.permute.xlu1 %40  ;;  %v31_v1 = vpop.permute.xlu0 %30  ;;  %v61_v5 = vrot.slane %v60_v63, 4  ;;  %v75_v13 = vrot.slane %v74_v4, 4 }
  0x86   :  { %v56_v2 = vmul.f32 %v41_v0, %v14_v61  ;;  %v54_v3 = vmul.f32 %v31_v1, %v12_v62 }
  0x87   :  { %v62_v16 = vadd.f32 %v61_v5, %v60_v63  ;;  %v76_v21 = vadd.f32 %v75_v13, %v74_v4 }
  0x88   :  { %v81_v8 = vsel %vm59_vm1, %v56_v2, 0.0  ;;  %v67_v9 = vsel %vm59_vm1, %v54_v3, 0.0 }
  0x89   :  { %v68_v10 = vrot.slane %v67_v9, 4  ;;  %v51_v11 = vpop.permute.xlu1 %50  ;;  %v46_v12 = vpop.permute.xlu0 %45  ;;  %v82_v17 = vrot.slane %v81_v8, 4  ;;  %v63_v23 = vrot.slane %v62_v16, 2  ;;  %v77_v29 = vrot.slane %v76_v21, 2 }
  0x8a   :  { %v58_v14 = vmul.f32 %v51_v11, %v16_v6  ;;  %v57_v15 = vmul.f32 %v46_v12, %v15_v7 }
  0x8b   :  { %v69_v18 = vadd.f32 %v68_v10, %v67_v9  ;;  %v83_v24 = vadd.f32 %v82_v17, %v81_v8  ;;  %v64_v31 = vadd.f32 %v63_v23, %v62_v16  ;;  %v78_v37 = vadd.f32 %v77_v29, %v76_v21 }
  0x8c   :  { %v95_v19 = vsel %vm59_vm1, %v58_v14, 0.0  ;;  %v88_v20 = vsel %vm59_vm1, %v57_v15, 0.0 }
  0x8d   :  { %v89_v22 = vrot.slane %v88_v20, 4  ;;  %v70_v25 = vrot.slane %v69_v18, 2  ;;  %v96_v26 = vrot.slane %v95_v19, 4  ;;  %v84_v32 = vrot.slane %v83_v24, 2 }
  0x8e   :  { %v65_v39 = vrot.slane %v64_v31, 1  ;;  %v79_v45 = vrot.slane %v78_v37, 1 }
  0x8f   :  { %v90_v30 = vadd.f32 %v89_v22, %v88_v20  ;;  %v71_v33 = vadd.f32 %v70_v25, %v69_v18  ;;  %v97_v34 = vadd.f32 %v96_v26, %v95_v19  ;;  %v85_v40 = vadd.f32 %v84_v32, %v83_v24 }
  0x90   :  { %v154_v27 = vpop.permute.xlu0 %153  ;;  %v66_v48 = vadd.f32 %v65_v39, %v64_v31  ;;  %v80_v55 = vadd.f32 %v79_v45, %v78_v37 }
  0x91   :  { %v159_v28 = vpop.permute.xlu1 %158  ;;  %219 = vrcp.f32 %v154_v27  ;;  %v91_v38 = vrot.slane %v90_v30, 2  ;;  %v72_v41 = vrot.slane %v71_v33, 1  ;;  %v98_v42 = vrot.slane %v97_v34, 2 }
  0x92   :  { %221 = vrcp.f32 %v159_v28  ;;  %v86_v49 = vrot.slane %v85_v40, 1 }
  0x93   :  { %v92_v46 = vadd.f32 %v91_v38, %v90_v30  ;;  %v73_v50 = vadd.f32 %v72_v41, %v71_v33  ;;  %v99_v51 = vadd.f32 %v98_v42, %v97_v34 }
  0x94   :  { %v164_v35 = vpop.permute.xlu0 %163  ;;  %v87_v58 = vadd.f32 %v86_v49, %v85_v40 }
  0x95   :  { %v169_v36 = vpop.permute.xlu1 %168  ;;  %223 = vrcp.f32 %v164_v35  ;;  %v93_v56 = vrot.slane %v92_v46, 1  ;;  %v100_v59 = vrot.slane %v99_v51, 1 }
  0x96   :  { %225 = vrcp.f32 %v169_v36 }
  0x97   :  { %v94_v0 = vadd.f32 %v93_v56, %v92_v46  ;;  %v101_v3 = vadd.f32 %v100_v59, %v99_v51 }
  0x98   :  { %v174_v43 = vpop.permute.xlu0 %173 }
  0x99   :  { %v179_v44 = vpop.permute.xlu1 %178  ;;  %227 = vrcp.f32 %v174_v43 }
  0x9a   :  { %229 = vrcp.f32 %v179_v44 }
  0x9b   :  { %v220_v47 = vpop.eup %219 }
  0x9c   :  { %v222_v52 = vpop.eup %221  ;;  %v182_v54 = vmul.f32 %v220_v47, %v66_v48 }
  0x9d   :  { %v184_v53 = vmul.f32 %v222_v52, %v73_v50 }
  0x9f   :  { %v224_v57 = vpop.eup %223  ;;  %v200_v62 = vsel %vm199_vm2, %v184_v53, %v182_v54 }
  0xa0   :  { %v226_v60 = vpop.eup %225  ;;  %v186_v61 = vmul.f32 %v224_v57, %v80_v55 }
  0xa1   :  { %v188_v63 = vmul.f32 %v226_v60, %v87_v58 }
  0xa2   :  { %v202_v1 = vsel %vm201_vm3, %v186_v61, %v200_v62 }
  0xa3   :  { %v228_v2 = vpop.eup %227  ;;  %v204_v7 = vsel %vm203_vm4, %v188_v63, %v202_v1 }
  0xa4   :  { %v230_v4 = vpop.eup %229  ;;  %v190_v5 = vmul.f32 %v228_v2, %v94_v0 }
  0xa5   :  { %v192_v6 = vmul.f32 %v230_v4, %v101_v3 }
  0xa6   :  { %v206_v8 = vsel %vm205_vm5, %v190_v5, %v204_v7 }
  0xa7   :  { %v208_v9 = vsel %vm207_vm6, %v192_v6, %v206_v8 }
  0xa8   :  { %211 = vst.msk [vmem:[%s300_s2] sm:$0x3f] %vm210_vm7, %v208_v9 }

// kernel: _lambda_.6
= control target key start
LH: loop header
LB: loop body
LE: loop exit
PB: predicated region body
PF: predicated region fallthrough
CT: control target
= control target key end

     0   :  { %v2585_v0 = vmov 0.0   ;;  %vm2586_vm0 = vmmov 0   ;;  %vm86_vm1 = vcmask 261120   ;;  %s2587_s30 = smov 96   ;;  %vm198_vm2 = vcmask 130048   ;;  %s2590_s26 = smov 112   ;;  %s3162_s2 = inlined_call_operand.vmem [shape: bf16[32,96], index: 2, kind: input, shape index: {}]   ;;  %s3163_s0 = inlined_call_operand.vmem [shape: f32[48,32], index: 0, kind: input, shape index: {}]   ;;  %s3164_s3 = inlined_call_operand.vmem [shape: f32[1,96], index: 3, kind: input, shape index: {}]   ;;  %s3165_s1 = inlined_call_operand.vmem [shape: f32[6,1,8], index: 1, kind: input, shape index: {}]   ;;  %s3166_s4 = inlined_call_operand.vmem [shape: bf16[32,32], index: 4, kind: input, shape index: {}]   ;;  %s3167_s5 = inlined_call_operand.vmem [shape: f32[1,32], index: 5, kind: input, shape index: {}]   ;;  %s3168_s8 = inlined_call_operand.vmem [shape: bf16[32,64], index: 8, kind: input, shape index: {}]   ;;  %s3169_s6 = inlined_call_operand.vmem [shape: f32[1,32], index: 6, kind: input, shape index: {}]   ;;  %s3170_s7 = inlined_call_operand.vmem [shape: f32[1,32], index: 7, kind: input, shape index: {}]   ;;  %s3171_s10 = inlined_call_operand.vmem [shape: bf16[64,32], index: 10, kind: input, shape index: {}]   ;;  %s3172_s9 = inlined_call_operand.vmem [shape: f32[1,64], index: 9, kind: input, shape index: {}]   ;;  %s3173_s11 = inlined_call_operand.vmem [shape: f32[1,32], index: 11, kind: input, shape index: {}]   ;;  %s3174_s12 = inlined_call_operand.vmem [shape: f32[1,32], index: 12, kind: input, shape index: {}]   ;;  %s3175_s13 = inlined_call_operand.vmem [shape: f32[1,32], index: 13, kind: input, shape index: {}]   ;;  %s3176_s14 = inlined_call_operand.vmem [shape: f32[48,32], index: 14, kind: output, shape index: {}]  }
   0x1   :  { %2250 = vmatprep.subr.bf16.mxu0 %v2585_v0  ;;  %v2485_v1 = vld [vmem:[%s3162_s2] sm:$0xff]   ;;  %2254 = vmatprep.mubr.msk.bf16.mxu0 %vm2586_vm0, %v2585_v0  ;;  %v2486_v2 = vld [vmem:[%s3162_s2 + $0x8] sm:$0xff]   ;;  %v50_v6 = vld [vmem:[%s3163_s0 + $0x10] sm:$0xff]  ;;  %vm568_vm3 = vcmask 1043456   ;;  %vm490_vm4 = vcmask 64512   ;;  %s2591_s27 = smov 48  }
   0x2   :  { %2272 = vmatprep.subr.bf16.mxu1 %v2585_v0  ;;  %2274 = vmatprep.mubr.msk.bf16.mxu1 %vm2586_vm0, %v2585_v0  ;;  %v48_v3 = vld [vmem:[%s3163_s0] sm:$0xff]  ;;  %v49_v4 = vld [vmem:[%s3163_s0 + $0x8] sm:$0xff]  ;;  %v51_v7 = vld [vmem:[%s3163_s0 + $0x18] sm:$0xff]  ;;  %s2592_s15 = smov 16   ;;  %vm1933_vm5 = vcmask 523264  }
   0x3   :  { %2251 = vmatpush3.bf16.msra.mxu0 %v2485_v1  ;;  %v60_v5 = vpack.c.bf16 %v49_v4, %v48_v3  ;;  %v61_v8 = vpack.c.bf16 %v51_v7, %v50_v6  ;;  %v52_v9 = vld [vmem:[%s3163_s0 + $0x20] sm:$0xff]  ;;  %v53_v10 = vld [vmem:[%s3163_s0 + $0x28] sm:$0xff] }
   0x4   :  { %2252 = vmatprep.subr.bf16.mxu0 %v2585_v0  ;;  %v62_v11 = vpack.c.bf16 %v53_v10, %v52_v9  ;;  %v2120_v12 = vld [vmem:[%s3164_s3] ss:$0 sm:$0xff]  ;;  %s2588_s3 = smov 64   ;;  %v2779_v56 = vld [vmem:[%s3165_s1 + $0x1] ss:$0 sm:$0xff] }
   0x5   :  { %v2773_v51 = vld [vmem:[%s3165_s1] ss:$0 sm:$0xff]  ;;  %v2792_v4 = vld [vmem:[%s3165_s1 + $0x3] ss:$0 sm:$0xff] }
   0x7   :  { %2253 = vmatpush3.bf16.msra.mxu0 %v2486_v2  ;;  %v2787_v2 = vld [vmem:[%s3165_s1 + $0x2] ss:$0 sm:$0xff] }
   0x8   :  { %2266 = vmatprep.subr.bf16.mxu0 %v2585_v0 }
   0xa   :  { %2255 = vmatmul.mubr.msk.bf16.vlgmr.msra.gmra.mrb[0].mxu0 %vm86_vm1, %v60_v5 }
   0xb   :  { %2258 = vmatprep.mubr.msk.bf16.mxu0 %vm2586_vm0, %v2585_v0 }
  0x12   :  { %2259 = vmatmul.mubr.msk.bf16.gmra.mrb[4].mxu0 %vm86_vm1, %v61_v8 }
  0x13   :  { %2262 = vmatprep.mubr.msk.bf16.mxu0 %vm2586_vm0, %v2585_v0 }
  0x1a   :  { %2263 = vmatmul.mubr.msk.bf16.gmra.mrb[8].mxu0 %vm86_vm1, %v62_v11 }
  0x1b   :  { %2268 = vmatprep.mubr.msk.bf16.mxu0 %vm2586_vm0, %v2585_v0 }
  0xdd   :  { %v130_v13 = vpop.f32.mrb[0].mxu0 }
  0xde   :  { %v131_v14 = vadd.f32 %v2120_v12, %v130_v13  ;;  %v2256_v15 = vpop.f32.mrb[1].mxu0 }
  0xdf   :  { %v133_v16 = vpop.f32.mrb[2].mxu0  ;;  %v2800_v15 = vld [vmem:[%s3165_s1 + $0x4] ss:$0 sm:$0xff] }
  0xe0   :  { %v2712_v17 = vpack.c.bf16 %v131_v14, %v131_v14  ;;  %v134_v18 = vadd.f32 %v2120_v12, %v133_v16  ;;  %v2257_v19 = vpop.f32.mrb[3].mxu0  ;;  %v2805_v16 = vld [vmem:[%s3165_s1 + $0x5] ss:$0 sm:$0xff]  ;;  %s2589_s1 = smov 80  }
  0xe2   :  { %196 = vrot.lane.b32.xlu0 %v2712_v17, %s2587_s30  ;;  %v2715_v20 = vpack.c.bf16 %v134_v18, %v134_v18 }
  0xe5   :  { %v138_v21 = vpop.f32.mrb[4].mxu0 }
  0xe6   :  { %v139_v22 = vadd.f32 %v2120_v12, %v138_v21  ;;  %246 = vrot.lane.b32.xlu0 %v2715_v20, %s2587_s30  ;;  %v2260_v23 = vpop.f32.mrb[5].mxu0 }
  0xe7   :  { %v141_v24 = vpop.f32.mrb[6].mxu0 }
  0xe8   :  { %v2718_v25 = vpack.c.bf16 %v139_v22, %v139_v22  ;;  %v142_v26 = vadd.f32 %v2120_v12, %v141_v24  ;;  %v2261_v27 = vpop.f32.mrb[7].mxu0 }
  0xea   :  { %v2720_v28 = vpack.c.bf16 %v142_v26, %v142_v26  ;;  %295 = vrot.lane.b32.xlu1 %v2718_v25, %s2587_s30 }
  0xed   :  { %v146_v29 = vpop.f32.mrb[8].mxu0 }
  0xee   :  { %v147_v30 = vadd.f32 %v2120_v12, %v146_v29  ;;  %344 = vrot.lane.b32.xlu1 %v2720_v28, %s2587_s30  ;;  %v2264_v31 = vpop.f32.mrb[9].mxu0 }
  0xef   :  { %v149_v32 = vpop.f32.mrb[10].mxu0 }
  0xf0   :  { %v2724_v33 = vpack.c.bf16 %v147_v30, %v147_v30  ;;  %v150_v34 = vadd.f32 %v2120_v12, %v149_v32  ;;  %v2265_v35 = vpop.f32.mrb[11].mxu0 }
  0xf2   :  { %v2726_v36 = vpack.c.bf16 %v150_v34, %v150_v34  ;;  %393 = vrot.lane.b32.xlu0 %v2724_v33, %s2587_s30 }
  0xf4   :  { %442 = vrot.lane.b32.xlu1 %v2726_v36, %s2587_s30 }
  0xf8   :  { %563 = vrot.lane.b32.xlu1 %v2712_v17, %s2588_s3 }
 0x154   :  { %v197_v37 = vpop.permute.xlu0 %196 }
 0x155   :  { %v203_v38 = vsel %vm198_vm2, %v197_v37, 0 }
 0x156   :  { %2267 = vmatpush3.bf16.xpose.msra.mxu0 %v203_v38 }
 0x157   :  { %2284 = vmatprep.subr.bf16.mxu0 %v2585_v0 }
 0x158   :  { %v247_v39 = vpop.permute.xlu0 %246 }
 0x159   :  { %v252_v40 = vsel %vm198_vm2, %v247_v39, 0 }
 0x15a   :  { %2273 = vmatpush3.bf16.xpose.msra.mxu1 %v252_v40 }
 0x15b   :  { %2278 = vmatprep.subr.bf16.mxu1 %v2585_v0 }
 0x15c   :  { %v296_v41 = vpop.permute.xlu1 %295 }
 0x15d   :  { %2269 = vmatmul.mubr.msk.bf16.vlgmr.msra.gmra.mrb[12].mxu0 %vm198_vm2, %v2712_v17  ;;  %v301_v42 = vsel %vm198_vm2, %v296_v41, 0 }
 0x15e   :  { %2286 = vmatprep.mubr.msk.bf16.mxu0 %vm2586_vm0, %v2585_v0 }
 0x160   :  { %v345_v43 = vpop.permute.xlu1 %344 }
 0x161   :  { %v350_v44 = vsel %vm198_vm2, %v345_v43, 0  ;;  %2275 = vmatmul.mubr.msk.bf16.vlgmr.msra.gmra.mrb[0].mxu1 %vm198_vm2, %v2715_v20 }
 0x162   :  { %2279 = vmatpush3.bf16.xpose.msra.mxu1 %v301_v42  ;;  %2285 = vmatpush3.bf16.xpose.msra.mxu0 %v350_v44 }
 0x163   :  { %2280 = vmatprep.mubr.msk.bf16.mxu1 %vm2586_vm0, %v2585_v0  ;;  %2290 = vmatprep.subr.bf16.mxu1 %v2585_v0 }
 0x164   :  { %v394_v45 = vpop.permute.xlu0 %393  ;;  %2296 = vmatprep.subr.bf16.mxu0 %v2585_v0 }
 0x165   :  { %v399_v48 = vsel %vm198_vm2, %v394_v45, 0 }
 0x166   :  { %v443_v46 = vpop.permute.xlu1 %442 }
 0x167   :  { %v448_v47 = vsel %vm198_vm2, %v443_v46, 0 }
 0x169   :  { %2281 = vmatmul.mubr.msk.bf16.vlgmr.msra.gmra.mrb[4].mxu1 %vm198_vm2, %v2718_v25  ;;  %2287 = vmatmul.mubr.msk.bf16.vlgmr.msra.gmra.mrb[16].mxu0 %vm198_vm2, %v2720_v28 }
 0x16a   :  { %2291 = vmatpush3.bf16.xpose.msra.mxu1 %v399_v48  ;;  %2297 = vmatpush3.bf16.xpose.msra.mxu0 %v448_v47  ;;  %v564_v49 = vpop.permute.xlu1 %563 }
 0x16b   :  { %2292 = vmatprep.mubr.msk.bf16.mxu1 %vm2586_vm0, %v2585_v0  ;;  %2298 = vmatprep.mubr.msk.bf16.mxu0 %vm2586_vm0, %v2585_v0  ;;  %v570_v50 = vsel %vm568_vm3, %v564_v49, 0 }
 0x16c   :  { %2302 = vmatprep.subr.bf16.mxu1 %v2585_v0  ;;  %2308 = vmatprep.subr.bf16.mxu0 %v2585_v0 }
 0x171   :  { %2293 = vmatmul.mubr.msk.bf16.vlgmr.msra.gmra.mrb[8].mxu1 %vm198_vm2, %v2724_v33  ;;  %2299 = vmatmul.mubr.msk.bf16.vlgmr.msra.gmra.mrb[20].mxu0 %vm198_vm2, %v2726_v36 }
 0x172   :  { %2303 = vmatpush3.bf16.msra.mxu1 %v570_v50  ;;  %2304 = vmatprep.mubr.msk.bf16.mxu1 %vm2586_vm0, %v2585_v0 }
 0x173   :  { %2314 = vmatprep.subr.bf16.mxu1 %v2585_v0  ;;  %2310 = vmatprep.mubr.msk.bf16.mxu0 %vm2586_vm0, %v2585_v0 }
 0x230   :  { %v239_v52 = vpop.f32.mrb[12].mxu0 }
 0x231   :  { %v240_v53 = vadd.f32 %v2773_v51, %v239_v52  ;;  %v2270_v54 = vpop.f32.mrb[13].mxu0 }
 0x232   :  { %v242_v55 = vpop.f32.mrb[14].mxu0 }
 0x233   :  { %v2271_v57 = vpop.f32.mrb[15].mxu0  ;;  %v491_v58 = vsel %vm490_vm4, %v240_v53, -inf }
 0x234   :  { %v288_v59 = vpop.f32.mrb[0].mxu1  ;;  %492 = vmax.xlane.f32.xlu0 %v491_v58 }
 0x235   :  { %v289_v60 = vadd.f32 %v2779_v56, %v288_v59  ;;  %v2276_v61 = vpop.f32.mrb[1].mxu1 }
 0x236   :  { %v291_v62 = vpop.f32.mrb[2].mxu1 }
 0x237   :  { %v2277_v63 = vpop.f32.mrb[3].mxu1  ;;  %v494_v1 = vsel %vm490_vm4, %v289_v60, -inf }
 0x238   :  { %495 = vmax.xlane.f32.xlu1 %v494_v1 }
 0x23c   :  { %v337_v3 = vpop.f32.mrb[4].mxu1  ;;  %v386_v5 = vpop.f32.mrb[16].mxu0 }
 0x23d   :  { %v338_v6 = vadd.f32 %v2787_v2, %v337_v3  ;;  %v2282_v7 = vpop.f32.mrb[5].mxu1  ;;  %v2288_v8 = vpop.f32.mrb[17].mxu0  ;;  %v387_v11 = vadd.f32 %v2792_v4, %v386_v5 }
 0x23e   :  { %v340_v9 = vpop.f32.mrb[6].mxu1  ;;  %v389_v10 = vpop.f32.mrb[18].mxu0 }
 0x23f   :  { %v2283_v12 = vpop.f32.mrb[7].mxu1  ;;  %v2289_v13 = vpop.f32.mrb[19].mxu0  ;;  %v497_v14 = vsel %vm490_vm4, %v338_v6, -inf  ;;  %v500_v18 = vsel %vm490_vm4, %v387_v11, -inf }
 0x240   :  { %498 = vmax.xlane.f32.xlu0 %v497_v14 }
 0x244   :  { %v435_v19 = vpop.f32.mrb[8].mxu1  ;;  %501 = vmax.xlane.f32.xlu0 %v500_v18  ;;  %v484_v21 = vpop.f32.mrb[20].mxu0 }
 0x245   :  { %v436_v22 = vadd.f32 %v2800_v15, %v435_v19  ;;  %v485_v23 = vadd.f32 %v2805_v16, %v484_v21  ;;  %v2294_v24 = vpop.f32.mrb[9].mxu1  ;;  %v2300_v26 = vpop.f32.mrb[21].mxu0 }
 0x246   :  { %v438_v27 = vpop.f32.mrb[10].mxu1  ;;  %v487_v29 = vpop.f32.mrb[22].mxu0 }
 0x247   :  { %v2295_v30 = vpop.f32.mrb[11].mxu1  ;;  %v2301_v31 = vpop.f32.mrb[23].mxu0  ;;  %v503_v32 = vsel %vm490_vm4, %v436_v22, -inf  ;;  %v506_v34 = vsel %vm490_vm4, %v485_v23, -inf }
 0x248   :  { %504 = vmax.xlane.f32.xlu1 %v503_v32  ;;  %507 = vmax.xlane.f32.xlu0 %v506_v34 }
 0x259   :  { %660 = vrot.lane.b32.xlu1 %v2718_v25, %s2588_s3 }
 0x25d   :  { %708 = vrot.lane.b32.xlu1 %v2720_v28, %s2588_s3 }
 0x25e   :  { %612 = vrot.lane.b32.xlu0 %v2715_v20, %s2588_s3 }
 0x2c1   :  { %v493_v35 = vpop.xlane.xlu0 %492 }
 0x2c2   :  { %v509_v37 = vsub.f32 %v240_v53, %v493_v35 }
 0x2c4   :  { %v515_v38 = vmul.f32 1.442695, %v509_v37 }
 0x2c5   :  { %v496_v39 = vpop.xlane.xlu1 %495 }
 0x2c6   :  { %2495 = vpow2.f32 %v515_v38  ;;  %v510_v40 = vsub.f32 %v289_v60, %v496_v39 }
 0x2c8   :  { %v517_v41 = vmul.f32 1.442695, %v510_v40 }
 0x2ca   :  { %2497 = vpow2.f32 %v517_v41 }
 0x2cd   :  { %v499_v42 = vpop.xlane.xlu0 %498 }
 0x2ce   :  { %v511_v43 = vsub.f32 %v338_v6, %v499_v42 }
 0x2d0   :  { %v2496_v44 = vpop.eup %2495  ;;  %v519_v45 = vmul.f32 1.442695, %v511_v43 }
 0x2d1   :  { %v502_v46 = vpop.xlane.xlu0 %501  ;;  %v527_v47 = vsel %vm490_vm4, %v2496_v44, 0.0 }
 0x2d2   :  { %2499 = vpow2.f32 %v519_v45  ;;  %v512_v48 = vsub.f32 %v387_v11, %v502_v46  ;;  %528 = vadd.xlane.f32.xlu1 %v527_v47 }
 0x2d4   :  { %v2498_v49 = vpop.eup %2497  ;;  %v521_v50 = vmul.f32 1.442695, %v512_v48 }
 0x2d5   :  { %v508_v52 = vpop.xlane.xlu0 %507  ;;  %v530_v53 = vsel %vm490_vm4, %v2498_v49, 0.0  ;;  %v505_v61 = vpop.xlane.xlu1 %504 }
 0x2d6   :  { %2501 = vpow2.f32 %v521_v50  ;;  %531 = vadd.xlane.f32.xlu0 %v530_v53  ;;  %v513_v62 = vsub.f32 %v436_v22, %v505_v61  ;;  %v514_v1 = vsub.f32 %v485_v23, %v508_v52 }
 0x2d8   :  { %v523_v63 = vmul.f32 1.442695, %v513_v62  ;;  %v525_v3 = vmul.f32 1.442695, %v514_v1 }
 0x2d9   :  { %v613_v54 = vpop.permute.xlu0 %612  ;;  %v661_v9 = vpop.permute.xlu1 %660 }
 0x2da   :  { %v618_v55 = vsel %vm568_vm3, %v613_v54, 0  ;;  %2503 = vpow2.f32 %v523_v63  ;;  %v666_v22 = vsel %vm568_vm3, %v661_v9, 0 }
 0x2db   :  { %2309 = vmatpush3.bf16.msra.mxu0 %v618_v55  ;;  %2505 = vpow2.f32 %v525_v3 }
 0x2dc   :  { %v2821_v57 = vpop.eup %2499  ;;  %2320 = vmatprep.subr.bf16.mxu0 %v2585_v0 }
 0x2dd   :  { %v533_v58 = vsel %vm490_vm4, %v2821_v57, 0.0  ;;  %v709_v10 = vpop.permute.xlu1 %708 }
 0x2de   :  { %534 = vadd.xlane.f32.xlu1 %v533_v58  ;;  %v714_v27 = vsel %vm568_vm3, %v709_v10, 0 }
 0x2e0   :  { %v2826_v59 = vpop.eup %2501 }
 0x2e1   :  { %v536_v60 = vsel %vm490_vm4, %v2826_v59, 0.0 }
 0x2e2   :  { %537 = vadd.xlane.f32.xlu0 %v536_v60 }
 0x2e4   :  { %v2834_v5 = vpop.eup %2503 }
 0x2e5   :  { %v539_v6 = vsel %vm490_vm4, %v2834_v5, 0.0  ;;  %v2838_v7 = vpop.eup %2505 }
 0x2e6   :  { %v542_v8 = vsel %vm490_vm4, %v2838_v7, 0.0 }
 0x2ef   :  { %804 = vrot.lane.b32.xlu1 %v2726_v36, %s2588_s3 }
 0x2f8   :  { %756 = vrot.lane.b32.xlu0 %v2724_v33, %s2588_s3 }
 0x313   :  { %540 = vadd.xlane.f32.xlu1 %v539_v6 }
 0x317   :  { %543 = vadd.xlane.f32.xlu0 %v542_v8 }
 0x324   :  { %904 = vrot.lane.b32.xlu1 %v2715_v20, %s2589_s1 }
 0x328   :  { %902 = vrot.lane.b32.xlu1 %v2715_v20, %s2590_s26 }
 0x32c   :  { %1004 = vrot.lane.b32.xlu1 %v2720_v28, %s2589_s1 }
 0x32d   :  { %854 = vrot.lane.b32.xlu0 %v2712_v17, %s2589_s1 }
 0x330   :  { %1002 = vrot.lane.b32.xlu1 %v2720_v28, %s2590_s26 }
 0x331   :  { %852 = vrot.lane.b32.xlu0 %v2712_v17, %s2590_s26 }
 0x334   :  { %1104 = vrot.lane.b32.xlu1 %v2726_v36, %s2589_s1 }
 0x335   :  { %954 = vrot.lane.b32.xlu0 %v2718_v25, %s2589_s1 }
 0x338   :  { %1102 = vrot.lane.b32.xlu1 %v2726_v36, %s2590_s26 }
 0x339   :  { %952 = vrot.lane.b32.xlu0 %v2718_v25, %s2590_s26 }
 0x33d   :  { %1054 = vrot.lane.b32.xlu0 %v2724_v33, %s2589_s1 }
 0x341   :  { %1052 = vrot.lane.b32.xlu0 %v2724_v33, %s2590_s26 }
 0x35f   :  { %v529_v11 = vpop.xlane.xlu1 %528 }
 0x360   :  { %2507 = vrcp.f32 %v529_v11 }
 0x363   :  { %v532_v12 = vpop.xlane.xlu0 %531 }
 0x364   :  { %2509 = vrcp.f32 %v532_v12 }
 0x36a   :  { %v2508_v13 = vpop.eup %2507 }
 0x36b   :  { %v551_v14 = vmul.f32 %v2508_v13, %v2496_v44  ;;  %v535_v18 = vpop.xlane.xlu1 %534 }
 0x36c   :  { %2511 = vrcp.f32 %v535_v18 }
 0x36d   :  { %v557_v19 = vpack.c.bf16 %v551_v14, %v551_v14 }
 0x36e   :  { %v2510_v21 = vpop.eup %2509 }
 0x36f   :  { %v552_v23 = vmul.f32 %v2510_v21, %v2498_v49  ;;  %2305 = vmatmul.mubr.msk.bf16.vlgmr.msra.gmra.mrb[12].mxu1 %vm490_vm4, %v557_v19  ;;  %v538_v24 = vpop.xlane.xlu0 %537  ;;  %v805_v38 = vpop.permute.xlu1 %804 }
 0x370   :  { %2315 = vmatpush3.bf16.msra.mxu1 %v666_v22  ;;  %2513 = vrcp.f32 %v538_v24  ;;  %2316 = vmatprep.mubr.msk.bf16.mxu1 %vm2586_vm0, %v2585_v0  ;;  %v810_v40 = vsel %vm568_vm3, %v805_v38, 0 }
 0x371   :  { %v558_v26 = vpack.c.bf16 %v552_v23, %v552_v23  ;;  %2326 = vmatprep.subr.bf16.mxu1 %v2585_v0 }
 0x373   :  { %2311 = vmatmul.mubr.msk.bf16.vlgmr.msra.gmra.mrb[24].mxu0 %vm490_vm4, %v558_v26  ;;  %v757_v31 = vpop.permute.xlu0 %756 }
 0x374   :  { %2321 = vmatpush3.bf16.msra.mxu0 %v714_v27  ;;  %2322 = vmatprep.mubr.msk.bf16.mxu0 %vm2586_vm0, %v2585_v0  ;;  %v762_v37 = vsel %vm568_vm3, %v757_v31, 0 }
 0x375   :  { %2332 = vmatprep.subr.bf16.mxu0 %v2585_v0 }
 0x376   :  { %v2512_v29 = vpop.eup %2511 }
 0x377   :  { %v553_v30 = vmul.f32 %v2512_v29, %v2821_v57 }
 0x379   :  { %v559_v32 = vpack.c.bf16 %v553_v30, %v553_v30 }
 0x37a   :  { %v2514_v34 = vpop.eup %2513 }
 0x37b   :  { %v554_v35 = vmul.f32 %v2514_v34, %v2826_v59  ;;  %2317 = vmatmul.mubr.msk.bf16.vlgmr.msra.gmra.mrb[16].mxu1 %vm490_vm4, %v559_v32 }
 0x37c   :  { %2327 = vmatpush3.bf16.msra.mxu1 %v762_v37  ;;  %2328 = vmatprep.mubr.msk.bf16.mxu1 %vm2586_vm0, %v2585_v0 }
 0x37d   :  { %v560_v39 = vpack.c.bf16 %v554_v35, %v554_v35  ;;  %2338 = vmatprep.subr.bf16.mxu1 %v2585_v0 }
 0x37f   :  { %2323 = vmatmul.mubr.msk.bf16.vlgmr.msra.gmra.mrb[28].mxu0 %vm490_vm4, %v560_v39 }
 0x380   :  { %2333 = vmatpush3.bf16.msra.mxu0 %v810_v40  ;;  %2334 = vmatprep.mubr.msk.bf16.mxu0 %vm2586_vm0, %v2585_v0 }
 0x381   :  { %2344 = vmatprep.subr.bf16.mxu0 %v2585_v0 }
 0x3a0   :  { %v541_v41 = vpop.xlane.xlu1 %540 }
 0x3a1   :  { %2515 = vrcp.f32 %v541_v41 }
 0x3a4   :  { %v544_v42 = vpop.xlane.xlu0 %543  ;;  %v905_v44 = vpop.permute.xlu1 %904 }
 0x3a5   :  { %2517 = vrcp.f32 %v544_v42  ;;  %v910_v57 = vsel %vm198_vm2, %v905_v44, 0 }
 0x3a8   :  { %v855_v43 = vpop.permute.xlu0 %854  ;;  %v903_v50 = vpop.permute.xlu1 %902 }
 0x3a9   :  { %v860_v53 = vsel %vm198_vm2, %v855_v43, 0 }
 0x3ab   :  { %v2516_v45 = vpop.eup %2515 }
 0x3ac   :  { %v555_v46 = vmul.f32 %v2516_v45, %v2834_v5  ;;  %v853_v47 = vpop.permute.xlu0 %852  ;;  %v1005_v58 = vpop.permute.xlu1 %1004 }
 0x3ad   :  { %v1010_v62 = vsel %vm198_vm2, %v1005_v58, 0 }
 0x3ae   :  { %v561_v48 = vpack.c.bf16 %v555_v46, %v555_v46 }
 0x3af   :  { %v2518_v49 = vpop.eup %2517 }
 0x3b0   :  { %v556_v52 = vmul.f32 %v2518_v49, %v2838_v7  ;;  %2329 = vmatmul.mubr.msk.bf16.vlgmr.msra.gmra.mrb[20].mxu1 %vm490_vm4, %v561_v48  ;;  %v955_v54 = vpop.permute.xlu0 %954  ;;  %v1003_v61 = vpop.permute.xlu1 %1002 }
 0x3b1   :  { %2339 = vmatpush3.bf16.xpose.msra.mxu1 %v860_v53  ;;  %2340 = vmatprep.mubr.msk.bf16.mxu1 %vm2586_vm0, %v2585_v0  ;;  %v960_v60 = vsel %vm198_vm2, %v955_v54, 0 }
 0x3b2   :  { %v562_v55 = vpack.c.bf16 %v556_v52, %v556_v52  ;;  %2350 = vmatprep.subr.bf16.mxu1 %v2585_v0 }
 0x3b4   :  { %2335 = vmatmul.mubr.msk.bf16.vlgmr.msra.gmra.mrb[32].mxu0 %vm490_vm4, %v562_v55  ;;  %v953_v59 = vpop.permute.xlu0 %952  ;;  %v1105_v3 = vpop.permute.xlu1 %1104 }
 0x3b5   :  { %2345 = vmatpush3.bf16.xpose.msra.mxu0 %v910_v57  ;;  %2346 = vmatprep.mubr.msk.bf16.mxu0 %vm2586_vm0, %v2585_v0  ;;  %v1110_v5 = vsel %vm198_vm2, %v1105_v3, 0 }
 0x3b6   :  { %2356 = vmatprep.subr.bf16.mxu0 %v2585_v0 }
 0x3b8   :  { %2341 = vmatmul.mubr.msk.bf16.vlgmr.msra.gmra.mrb[24].mxu1 %vm198_vm2, %v853_v47  ;;  %v1055_v63 = vpop.permute.xlu0 %1054  ;;  %v1103_v7 = vpop.permute.xlu1 %1102 }
 0x3b9   :  { %2351 = vmatpush3.bf16.xpose.msra.mxu1 %v960_v60  ;;  %2352 = vmatprep.mubr.msk.bf16.mxu1 %vm2586_vm0, %v2585_v0  ;;  %v1060_v1 = vsel %vm198_vm2, %v1055_v63, 0 }
 0x3ba   :  { %2362 = vmatprep.subr.bf16.mxu1 %v2585_v0 }
 0x3bc   :  { %2347 = vmatmul.mubr.msk.bf16.vlgmr.msra.gmra.mrb[36].mxu0 %vm198_vm2, %v903_v50  ;;  %v1053_v6 = vpop.permute.xlu0 %1052 }
 0x3bd   :  { %2357 = vmatpush3.bf16.xpose.msra.mxu0 %v1010_v62  ;;  %2358 = vmatprep.mubr.msk.bf16.mxu0 %vm2586_vm0, %v2585_v0 }
 0x3be   :  { %2368 = vmatprep.subr.bf16.mxu0 %v2585_v0 }
 0x3c0   :  { %2353 = vmatmul.mubr.msk.bf16.vlgmr.msra.gmra.mrb[28].mxu1 %vm198_vm2, %v953_v59 }
 0x3c1   :  { %2363 = vmatpush3.bf16.xpose.msra.mxu1 %v1060_v1  ;;  %2364 = vmatprep.mubr.msk.bf16.mxu1 %vm2586_vm0, %v2585_v0 }
 0x3c2   :  { %2374 = vmatprep.subr.bf16.mxu1 %v2585_v0 }
 0x3c4   :  { %2359 = vmatmul.mubr.msk.bf16.vlgmr.msra.gmra.mrb[40].mxu0 %vm198_vm2, %v1003_v61 }
 0x3c5   :  { %2369 = vmatpush3.bf16.xpose.msra.mxu0 %v1110_v5  ;;  %2370 = vmatprep.mubr.msk.bf16.mxu0 %vm2586_vm0, %v2585_v0 }
 0x3c6   :  { %2380 = vmatprep.subr.bf16.mxu0 %v2585_v0 }
 0x3c8   :  { %2365 = vmatmul.mubr.msk.bf16.vlgmr.msra.gmra.mrb[32].mxu1 %vm198_vm2, %v1053_v6 }
 0x3c9   :  { %2376 = vmatprep.mubr.msk.bf16.mxu1 %vm2586_vm0, %v2585_v0 }
 0x3cc   :  { %2371 = vmatmul.mubr.msk.bf16.vlgmr.msra.gmra.mrb[44].mxu0 %vm198_vm2, %v1103_v7 }
 0x3cd   :  { %2382 = vmatprep.mubr.msk.bf16.mxu0 %vm2586_vm0, %v2585_v0 }
 0x442   :  { %v2914_v8 = vpop.f32.mrb[12].mxu1 }
 0x443   :  { %v2306_v9 = vpop.f32.mrb[13].mxu1 }
 0x444   :  { %v609_v10 = vpop.f32.mrb[14].mxu1 }
 0x445   :  { %v2307_v11 = vpop.f32.mrb[15].mxu1 }
 0x446   :  { %v2916_v12 = vpop.f32.mrb[24].mxu0 }
 0x447   :  { %v2312_v13 = vpop.f32.mrb[25].mxu0 }
 0x448   :  { %v657_v14 = vpop.f32.mrb[26].mxu0 }
 0x449   :  { %v2313_v18 = vpop.f32.mrb[27].mxu0 }
 0x44e   :  { %v2918_v19 = vpop.f32.mrb[16].mxu1 }
 0x44f   :  { %v2318_v21 = vpop.f32.mrb[17].mxu1 }
 0x450   :  { %v705_v22 = vpop.f32.mrb[18].mxu1 }
 0x451   :  { %v2319_v23 = vpop.f32.mrb[19].mxu1 }
 0x452   :  { %v2920_v24 = vpop.f32.mrb[28].mxu0 }
 0x453   :  { %v2324_v26 = vpop.f32.mrb[29].mxu0 }
 0x454   :  { %v753_v27 = vpop.f32.mrb[30].mxu0 }
 0x455   :  { %v2325_v29 = vpop.f32.mrb[31].mxu0 }
 0x483   :  { %v2922_v30 = vpop.f32.mrb[20].mxu1 }
 0x484   :  { %v2330_v31 = vpop.f32.mrb[21].mxu1 }
 0x485   :  { %v801_v32 = vpop.f32.mrb[22].mxu1 }
 0x486   :  { %v2331_v34 = vpop.f32.mrb[23].mxu1 }
 0x487   :  { %v2924_v35 = vpop.f32.mrb[32].mxu0 }
 0x488   :  { %v2336_v37 = vpop.f32.mrb[33].mxu0 }
 0x489   :  { %v849_v38 = vpop.f32.mrb[34].mxu0 }
 0x48a   :  { %v2337_v39 = vpop.f32.mrb[35].mxu0 }
 0x48b   :  { %v896_v40 = vpop.f32.mrb[24].mxu1 }
 0x48c   :  { %v897_v41 = vadd.f32 %v2773_v51, %v896_v40  ;;  %v2342_v42 = vpop.f32.mrb[25].mxu1 }
 0x48d   :  { %v899_v43 = vpop.f32.mrb[26].mxu1 }
 0x48e   :  { %v2343_v44 = vpop.f32.mrb[27].mxu1  ;;  %v1152_v45 = vsel %vm490_vm4, %v897_v41, -inf }
 0x48f   :  { %1153 = vmax.xlane.f32.xlu0 %v1152_v45  ;;  %v946_v46 = vpop.f32.mrb[36].mxu0 }
 0x490   :  { %v947_v47 = vadd.f32 %v2779_v56, %v946_v46  ;;  %v2348_v48 = vpop.f32.mrb[37].mxu0 }
 0x491   :  { %v949_v49 = vpop.f32.mrb[38].mxu0 }
 0x492   :  { %v2349_v50 = vpop.f32.mrb[39].mxu0  ;;  %v1155_v52 = vsel %vm490_vm4, %v947_v47, -inf }
 0x493   :  { %v996_v53 = vpop.f32.mrb[28].mxu1  ;;  %1156 = vmax.xlane.f32.xlu1 %v1155_v52 }
 0x494   :  { %v997_v54 = vadd.f32 %v2787_v2, %v996_v53  ;;  %v2354_v55 = vpop.f32.mrb[29].mxu1 }
 0x495   :  { %v999_v51 = vpop.f32.mrb[30].mxu1 }
 0x496   :  { %v2355_v57 = vpop.f32.mrb[31].mxu1  ;;  %v1158_v58 = vsel %vm490_vm4, %v997_v54, -inf }
 0x497   :  { %1159 = vmax.xlane.f32.xlu0 %v1158_v58  ;;  %v1046_v59 = vpop.f32.mrb[40].mxu0 }
 0x498   :  { %v1047_v60 = vadd.f32 %v2792_v4, %v1046_v59  ;;  %v2360_v61 = vpop.f32.mrb[41].mxu0 }
 0x499   :  { %v1049_v56 = vpop.f32.mrb[42].mxu0 }
 0x49a   :  { %v2361_v62 = vpop.f32.mrb[43].mxu0  ;;  %v1161_v63 = vsel %vm490_vm4, %v1047_v60, -inf }
 0x49b   :  { %v1096_v1 = vpop.f32.mrb[32].mxu1  ;;  %1162 = vmax.xlane.f32.xlu0 %v1161_v63 }
 0x49c   :  { %v1097_v3 = vadd.f32 %v2800_v15, %v1096_v1  ;;  %v2366_v5 = vpop.f32.mrb[33].mxu1 }
 0x49d   :  { %v1099_v2 = vpop.f32.mrb[34].mxu1 }
 0x49e   :  { %v2367_v6 = vpop.f32.mrb[35].mxu1  ;;  %v1164_v7 = vsel %vm490_vm4, %v1097_v3, -inf }
 0x49f   :  { %1165 = vmax.xlane.f32.xlu1 %v1164_v7  ;;  %v1146_v9 = vpop.f32.mrb[44].mxu0 }
 0x4a0   :  { %v1147_v10 = vadd.f32 %v2805_v16, %v1146_v9  ;;  %v2372_v11 = vpop.f32.mrb[45].mxu0 }
 0x4a1   :  { %v1149_v4 = vpop.f32.mrb[46].mxu0 }
 0x4a2   :  { %v2373_v13 = vpop.f32.mrb[47].mxu0  ;;  %v1167_v14 = vsel %vm490_vm4, %v1147_v10, -inf }
 0x4a3   :  { %1168 = vmax.xlane.f32.xlu0 %v1167_v14 }
 0x4b0   :  { %1224 = vrot.lane.b32.xlu1 %v2712_v17, %s2591_s27 }
 0x51c   :  { %v1154_v15 = vpop.xlane.xlu0 %1153 }
 0x51d   :  { %v1170_v18 = vsub.f32 %v897_v41, %v1154_v15 }
 0x51f   :  { %v1176_v21 = vmul.f32 1.442695, %v1170_v18 }
 0x520   :  { %v1157_v22 = vpop.xlane.xlu1 %1156 }
 0x521   :  { %2519 = vpow2.f32 %v1176_v21  ;;  %v1171_v23 = vsub.f32 %v947_v47, %v1157_v22 }
 0x523   :  { %v1178_v26 = vmul.f32 1.442695, %v1171_v23 }
 0x524   :  { %v1160_v17 = vpop.xlane.xlu0 %1159 }
 0x525   :  { %2521 = vpow2.f32 %v1178_v26  ;;  %v1172_v39 = vsub.f32 %v997_v54, %v1160_v17 }
 0x527   :  { %v1180_v42 = vmul.f32 1.442695, %v1172_v39 }
 0x528   :  { %v1163_v38 = vpop.xlane.xlu0 %1162 }
 0x529   :  { %v1173_v40 = vsub.f32 %v1047_v60, %v1163_v38  ;;  %2523 = vpow2.f32 %v1180_v42 }
 0x52b   :  { %v2520_v27 = vpop.eup %2519  ;;  %v1182_v44 = vmul.f32 1.442695, %v1173_v40 }
 0x52c   :  { %v1166_v16 = vpop.xlane.xlu1 %1165  ;;  %v1188_v29 = vsel %vm490_vm4, %v2520_v27, 0.0 }
 0x52d   :  { %1189 = vadd.xlane.f32.xlu1 %v1188_v29  ;;  %v1174_v43 = vsub.f32 %v1097_v3, %v1166_v16  ;;  %2525 = vpow2.f32 %v1182_v44 }
 0x52f   :  { %v2522_v31 = vpop.eup %2521  ;;  %v1184_v46 = vmul.f32 1.442695, %v1174_v43 }
 0x530   :  { %v1225_v32 = vpop.permute.xlu1 %1224  ;;  %v1191_v34 = vsel %vm490_vm4, %v2522_v31, 0.0  ;;  %v1169_v41 = vpop.xlane.xlu0 %1168 }
 0x531   :  { %v1230_v37 = vsel %vm568_vm3, %v1225_v32, 0  ;;  %1192 = vadd.xlane.f32.xlu0 %v1191_v34  ;;  %v1175_v45 = vsub.f32 %v1147_v10, %v1169_v41  ;;  %2527 = vpow2.f32 %v1184_v46  ;;  %v2488_v32 = vld [vmem:[%s3166_s4 + $0x8] sm:$0xff]  }
 0x532   :  { %2375 = vmatpush3.bf16.msra.mxu1 %v1230_v37 }
 0x533   :  { %2386 = vmatprep.subr.bf16.mxu1 %v2585_v0  ;;  %v1186_v47 = vmul.f32 1.442695, %v1175_v45 }
 0x535   :  { %2529 = vpow2.f32 %v1186_v47 }
 0x53e   :  { %1320 = vrot.lane.b32.xlu1 %v2718_v25, %s2591_s27  ;;  %v2524_v25 = vpop.eup %2523 }
 0x53f   :  { %v1194_v49 = vsel %vm490_vm4, %v2524_v25, 0.0 }
 0x542   :  { %1368 = vrot.lane.b32.xlu1 %v2720_v28, %s2591_s27  ;;  %v2526_v28 = vpop.eup %2525 }
 0x543   :  { %v2528_v48 = vpop.eup %2527 }
 0x544   :  { %v2530_v50 = vpop.eup %2529  ;;  %v1200_v52 = vsel %vm490_vm4, %v2528_v48, 0.0 }
 0x545   :  { %v1203_v53 = vsel %vm490_vm4, %v2530_v50, 0.0 }
 0x547   :  { %1272 = vrot.lane.b32.xlu0 %v2715_v20, %s2591_s27  ;;  %v1197_v20 = vsel %vm490_vm4, %v2526_v28, 0.0 }
 0x566   :  { %1195 = vadd.xlane.f32.xlu1 %v1194_v49  ;;  %1198 = vadd.xlane.f32.xlu0 %v1197_v20 }
 0x56a   :  { %1201 = vadd.xlane.f32.xlu1 %v1200_v52  ;;  %1204 = vadd.xlane.f32.xlu0 %v1203_v53 }
 0x57b   :  { %1464 = vrot.lane.b32.xlu1 %v2726_v36, %s2591_s27 }
 0x580   :  { %1416 = vrot.lane.b32.xlu0 %v2724_v33, %s2591_s27 }
 0x5ba   :  { %v1190_v54 = vpop.xlane.xlu1 %1189 }
 0x5bb   :  { %2531 = vrcp.f32 %v1190_v54 }
 0x5be   :  { %v1193_v55 = vpop.xlane.xlu0 %1192  ;;  %v1321_v59 = vpop.permute.xlu1 %1320 }
 0x5bf   :  { %2533 = vrcp.f32 %v1193_v55  ;;  %v1326_v36 = vsel %vm568_vm3, %v1321_v59, 0 }
 0x5c2   :  { %v1273_v51 = vpop.permute.xlu0 %1272  ;;  %v1369_v33 = vpop.permute.xlu1 %1368 }
 0x5c3   :  { %v1278_v57 = vsel %vm568_vm3, %v1273_v51, 0  ;;  %v1374_v1 = vsel %vm568_vm3, %v1369_v33, 0 }
 0x5c4   :  { %2381 = vmatpush3.bf16.msra.mxu0 %v1278_v57 }
 0x5c5   :  { %v2532_v58 = vpop.eup %2531  ;;  %2392 = vmatprep.subr.bf16.mxu0 %v2585_v0 }
 0x5c6   :  { %v1212_v60 = vmul.f32 %v2532_v58, %v2520_v27 }
 0x5c8   :  { %v1218_v61 = vpack.c.bf16 %v1212_v60, %v1212_v60 }
 0x5c9   :  { %v2534_v56 = vpop.eup %2533 }
 0x5ca   :  { %v1213_v62 = vmul.f32 %v2534_v56, %v2522_v31  ;;  %2377 = vmatmul.mubr.msk.bf16.vlgmr.msra.gmra.mrb[36].mxu1 %vm490_vm4, %v1218_v61  ;;  %v2487_v31 = vld [vmem:[%s3166_s4] sm:$0xff]  }
 0x5cb   :  { %2387 = vmatpush3.bf16.msra.mxu1 %v1326_v36  ;;  %2388 = vmatprep.mubr.msk.bf16.mxu1 %vm2586_vm0, %v2585_v0 }
 0x5cc   :  { %v1219_v63 = vpack.c.bf16 %v1213_v62, %v1213_v62  ;;  %2398 = vmatprep.subr.bf16.mxu1 %v2585_v0 }
 0x5ce   :  { %2383 = vmatmul.mubr.msk.bf16.vlgmr.msra.gmra.mrb[48].mxu0 %vm490_vm4, %v1219_v63 }
 0x5cf   :  { %2393 = vmatpush3.bf16.msra.mxu0 %v1374_v1  ;;  %2394 = vmatprep.mubr.msk.bf16.mxu0 %vm2586_vm0, %v2585_v0 }
 0x5d0   :  { %2404 = vmatprep.subr.bf16.mxu0 %v2585_v0 }
 0x5f3   :  { %v1196_v3 = vpop.xlane.xlu1 %1195  ;;  %v1199_v5 = vpop.xlane.xlu0 %1198 }
 0x5f4   :  { %2535 = vrcp.f32 %v1196_v3 }
 0x5f5   :  { %2537 = vrcp.f32 %v1199_v5 }
 0x5f7   :  { %v1202_v2 = vpop.xlane.xlu1 %1201  ;;  %v1205_v6 = vpop.xlane.xlu0 %1204 }
 0x5f8   :  { %2539 = vrcp.f32 %v1202_v2 }
 0x5f9   :  { %2541 = vrcp.f32 %v1205_v6 }
 0x5fb   :  { %v1417_v4 = vpop.permute.xlu0 %1416  ;;  %v1465_v13 = vpop.permute.xlu1 %1464 }
 0x5fc   :  { %v1422_v22 = vsel %vm568_vm3, %v1417_v4, 0  ;;  %v1470_v23 = vsel %vm568_vm3, %v1465_v13, 0 }
 0x5fe   :  { %v2536_v7 = vpop.eup %2535 }
 0x5ff   :  { %v2538_v9 = vpop.eup %2537  ;;  %v1214_v10 = vmul.f32 %v2536_v7, %v2524_v25 }
 0x600   :  { %v1215_v11 = vmul.f32 %v2538_v9, %v2526_v28 }
 0x601   :  { %v1220_v14 = vpack.c.bf16 %v1214_v10, %v1214_v10 }
 0x602   :  { %v2540_v15 = vpop.eup %2539  ;;  %v1221_v18 = vpack.c.bf16 %v1215_v11, %v1215_v11 }
 0x603   :  { %v2542_v21 = vpop.eup %2541  ;;  %2389 = vmatmul.mubr.msk.bf16.vlgmr.msra.gmra.mrb[40].mxu1 %vm490_vm4, %v1220_v14  ;;  %v1216_v26 = vmul.f32 %v2540_v15, %v2528_v48 }
 0x604   :  { %2395 = vmatmul.mubr.msk.bf16.vlgmr.msra.gmra.mrb[52].mxu0 %vm490_vm4, %v1221_v18  ;;  %2399 = vmatpush3.bf16.msra.mxu1 %v1422_v22  ;;  %v1217_v27 = vmul.f32 %v2542_v21, %v2530_v50  ;;  %v2580_v22 = vld [vmem:[%s3163_s0 + $0x8] sm:$0xff] }
 0x605   :  { %2405 = vmatpush3.bf16.msra.mxu0 %v1470_v23  ;;  %2400 = vmatprep.mubr.msk.bf16.mxu1 %vm2586_vm0, %v2585_v0  ;;  %v1222_v16 = vpack.c.bf16 %v1216_v26, %v1216_v26 }
 0x606   :  { %2406 = vmatprep.mubr.msk.bf16.mxu0 %vm2586_vm0, %v2585_v0  ;;  %2410 = vmatprep.subr.bf16.mxu1 %v2585_v0  ;;  %v1223_v29 = vpack.c.bf16 %v1217_v27, %v1217_v27 }
 0x607   :  { %2426 = vmatprep.subr.bf16.mxu0 %v2585_v0 }
 0x60b   :  { %2401 = vmatmul.mubr.msk.bf16.vlgmr.msra.gmra.mrb[44].mxu1 %vm490_vm4, %v1222_v16 }
 0x60c   :  { %2407 = vmatmul.mubr.msk.bf16.vlgmr.msra.gmra.mrb[56].mxu0 %vm490_vm4, %v1223_v29  ;;  %2414 = vmatprep.mubr.msk.bf16.mxu1 %vm2586_vm0, %v2585_v0 }
 0x60d   :  { %2430 = vmatprep.mubr.msk.bf16.mxu0 %vm2586_vm0, %v2585_v0  ;;  %2411 = vmatpush3.bf16.msra.mxu1 %v2487_v31 }
 0x60e   :  { %2412 = vmatprep.subr.bf16.mxu1 %v2585_v0 }
 0x611   :  { %2413 = vmatpush3.bf16.msra.mxu1 %v2488_v32 }
 0x612   :  { %2442 = vmatprep.subr.bf16.mxu1 %v2585_v0 }
 0x69d   :  { %v1266_v34 = vpop.f32.mrb[36].mxu1 }
 0x69e   :  { %v2378_v37 = vpop.f32.mrb[37].mxu1 }
 0x69f   :  { %v1269_v17 = vpop.f32.mrb[38].mxu1  ;;  %v2581_v37 = vld [vmem:[%s3163_s0 + $0x10] sm:$0xff] }
 0x6a0   :  { %v2379_v38 = vpop.f32.mrb[39].mxu1 }
 0x6a1   :  { %v1314_v39 = vpop.f32.mrb[48].mxu0 }
 0x6a2   :  { %v2470_v40 = vpack.i.bf16 %v1314_v39, %v1266_v34  ;;  %v2384_v41 = vpop.f32.mrb[49].mxu0  ;;  %v2582_v39 = vld [vmem:[%s3163_s0 + $0x18] sm:$0xff] }
 0x6a3   :  { %v1317_v42 = vpop.f32.mrb[50].mxu0 }
 0x6a4   :  { %2471 = vrot.lane.b32.xlu0 %v2470_v40, %s2592_s15  ;;  %v2385_v43 = vpop.f32.mrb[51].mxu0 }
 0x6d6   :  { %v1362_v44 = vpop.f32.mrb[40].mxu1 }
 0x6d7   :  { %v1410_v45 = vpop.f32.mrb[52].mxu0  ;;  %v2390_v46 = vpop.f32.mrb[41].mxu1 }
 0x6d8   :  { %v2475_v47 = vpack.i.bf16 %v1410_v45, %v1362_v44  ;;  %v2396_v25 = vpop.f32.mrb[53].mxu0  ;;  %v1365_v28 = vpop.f32.mrb[42].mxu1 }
 0x6d9   :  { %v1413_v48 = vpop.f32.mrb[54].mxu0  ;;  %v2391_v49 = vpop.f32.mrb[43].mxu1  ;;  %v2583_v25 = vld [vmem:[%s3163_s0 + $0x20] sm:$0xff] }
 0x6da   :  { %2476 = vrot.lane.b32.xlu1 %v2475_v47, %s2592_s15  ;;  %v2397_v20 = vpop.f32.mrb[55].mxu0  ;;  %v2584_v49 = vld [vmem:[%s3163_s0 + $0x28] sm:$0xff] }
 0x6de   :  { %v1458_v50 = vpop.f32.mrb[44].mxu1 }
 0x6df   :  { %v1506_v52 = vpop.f32.mrb[56].mxu0  ;;  %v2402_v53 = vpop.f32.mrb[45].mxu1 }
 0x6e0   :  { %v2480_v54 = vpack.i.bf16 %v1506_v52, %v1458_v50  ;;  %v2408_v55 = vpop.f32.mrb[57].mxu0  ;;  %v1461_v51 = vpop.f32.mrb[46].mxu1 }
 0x6e1   :  { %v1509_v57 = vpop.f32.mrb[58].mxu0  ;;  %v2403_v58 = vpop.f32.mrb[47].mxu1 }
 0x6e2   :  { %2481 = vrot.lane.b32.xlu0 %v2480_v54, %s2592_s15  ;;  %v2409_v59 = vpop.f32.mrb[59].mxu0 }
 0x716   :  { %v2472_v60 = vpop.permute.xlu0 %2471 }
 0x717   :  { %v2474_v61 = vunpack.i.h.bf16 %v2472_v60  ;;  %v2473_v56 = vunpack.i.l.bf16 %v2472_v60 }
 0x719   :  { %v1537_v36 = vsel %vm198_vm2, %v2916_v12, %v2474_v61  ;;  %v1536_v62 = vsel %vm198_vm2, %v2914_v8, %v2473_v56  ;;  %v2489_v56 = vld [vmem:[%s3168_s8] sm:$0xff]  }
 0x71a   :  { %v1542_v33 = vpack.c.bf16 %v1537_v36, %v1536_v62  ;;  %2427 = vmatpush3.bf16.msra.mxu0 %v2489_v56  ;;  %v2490_v36 = vld [vmem:[%s3168_s8 + $0x8] sm:$0xff]  }
 0x71b   :  { %2428 = vmatprep.subr.bf16.mxu0 %v2585_v0 }
 0x71c   :  { %2415 = vmatmul.mubr.msk.bf16.vlgmr.msra.gmra.mrb[48].mxu1 %vm86_vm1, %v1542_v33 }
 0x71d   :  { %2418 = vmatprep.mubr.msk.bf16.mxu1 %vm2586_vm0, %v2585_v0 }
 0x71e   :  { %2429 = vmatpush3.bf16.msra.mxu0 %v2490_v36 }
 0x74c   :  { %v2477_v63 = vpop.permute.xlu1 %2476 }
 0x74d   :  { %v2479_v1 = vunpack.i.h.bf16 %v2477_v63  ;;  %v2478_v3 = vunpack.i.l.bf16 %v2477_v63 }
 0x74f   :  { %v1539_v5 = vsel %vm198_vm2, %v2920_v24, %v2479_v1  ;;  %v1538_v2 = vsel %vm198_vm2, %v2918_v19, %v2478_v3  ;;  %v2156_v19 = vld [vmem:[%s3167_s5] ss:$0 sm:$0xff] }
 0x750   :  { %v1543_v6 = vpack.c.bf16 %v1539_v5, %v1538_v2 }
 0x752   :  { %2419 = vmatmul.mubr.msk.bf16.gmra.mrb[52].mxu1 %vm86_vm1, %v1543_v6 }
 0x753   :  { %2422 = vmatprep.mubr.msk.bf16.mxu1 %vm2586_vm0, %v2585_v0 }
 0x754   :  { %v2482_v8 = vpop.permute.xlu0 %2481 }
 0x755   :  { %v2484_v12 = vunpack.i.h.bf16 %v2482_v8  ;;  %v2483_v7 = vunpack.i.l.bf16 %v2482_v8 }
 0x757   :  { %v1541_v9 = vsel %vm198_vm2, %v2924_v35, %v2484_v12  ;;  %v1540_v10 = vsel %vm198_vm2, %v2922_v30, %v2483_v7  ;;  %v2579_v30 = vld [vmem:[%s3163_s0] sm:$0xff] }
 0x758   :  { %v1544_v11 = vpack.c.bf16 %v1541_v9, %v1540_v10 }
 0x75a   :  { %2423 = vmatmul.mubr.msk.bf16.gmra.mrb[56].mxu1 %vm86_vm1, %v1544_v11 }
 0x75b   :  { %2450 = vmatprep.mubr.msk.bf16.mxu1 %vm2586_vm0, %v2585_v0 }
 0x7ef   :  { %v1611_v24 = vpop.f32.mrb[48].mxu1 }
 0x7f0   :  { %v1612_v4 = vadd.f32 %v2156_v19, %v1611_v24  ;;  %v2416_v13 = vpop.f32.mrb[49].mxu1 }
 0x7f1   :  { %v1614_v14 = vpop.f32.mrb[50].mxu1 }
 0x7f2   :  { %v1615_v15 = vadd.f32 %v2156_v19, %v1614_v14  ;;  %v2417_v18 = vpop.f32.mrb[51].mxu1  ;;  %v1634_v35 = vadd.f32 %v2579_v30, %v1612_v4 }
 0x7f4   :  { %v1642_v21 = vsel %vm86_vm1, %v1634_v35, 0.0  ;;  %v1635_v23 = vadd.f32 %v2580_v22, %v1615_v15 }
 0x7f5   :  { %1643 = vadd.xlane.f32.xlu1 %v1642_v21 }
 0x7f6   :  { %v1645_v26 = vsel %vm86_vm1, %v1635_v23, 0.0 }
 0x7f7   :  { %1646 = vadd.xlane.f32.xlu0 %v1645_v26 }
 0x825   :  { %v1619_v27 = vpop.f32.mrb[52].mxu1 }
 0x826   :  { %v1620_v16 = vadd.f32 %v2156_v19, %v1619_v27  ;;  %v2420_v29 = vpop.f32.mrb[53].mxu1  ;;  %v2162_v27 = vld [vmem:[%s3169_s6] ss:$0 sm:$0xff] }
 0x827   :  { %v1622_v31 = vpop.f32.mrb[54].mxu1 }
 0x828   :  { %v1623_v32 = vadd.f32 %v2156_v19, %v1622_v31  ;;  %v2421_v34 = vpop.f32.mrb[55].mxu1  ;;  %v1636_v17 = vadd.f32 %v2581_v37, %v1620_v16 }
 0x829   :  { %v2163_v34 = vld [vmem:[%s3170_s7] ss:$0 sm:$0xff] }
 0x82a   :  { %v1648_v38 = vsel %vm86_vm1, %v1636_v17, 0.0  ;;  %v1637_v40 = vadd.f32 %v2582_v39, %v1623_v32 }
 0x82b   :  { %1649 = vadd.xlane.f32.xlu0 %v1648_v38 }
 0x82c   :  { %v1651_v41 = vsel %vm86_vm1, %v1637_v40, 0.0 }
 0x82d   :  { %1652 = vadd.xlane.f32.xlu1 %v1651_v41  ;;  %v1627_v42 = vpop.f32.mrb[56].mxu1 }
 0x82e   :  { %v1628_v43 = vadd.f32 %v2156_v19, %v1627_v42  ;;  %v2424_v44 = vpop.f32.mrb[57].mxu1 }
 0x82f   :  { %v1630_v45 = vpop.f32.mrb[58].mxu1 }
 0x830   :  { %v1631_v46 = vadd.f32 %v2156_v19, %v1630_v45  ;;  %v2425_v47 = vpop.f32.mrb[59].mxu1  ;;  %v1638_v28 = vadd.f32 %v2583_v25, %v1628_v43 }
 0x832   :  { %v1654_v48 = vsel %vm86_vm1, %v1638_v28, 0.0  ;;  %v1639_v20 = vadd.f32 %v2584_v49, %v1631_v46 }
 0x833   :  { %1655 = vadd.xlane.f32.xlu0 %v1654_v48 }
 0x834   :  { %v1657_v50 = vsel %vm86_vm1, %v1639_v20, 0.0 }
 0x835   :  { %1658 = vadd.xlane.f32.xlu1 %v1657_v50 }
 0x882   :  { %v1644_v52 = vpop.xlane.xlu1 %1643 }
 0x883   :  { %v1661_v53 = vmul.f32 0.03125, %v1644_v52 }
 0x884   :  { %v1647_v54 = vpop.xlane.xlu0 %1646 }
 0x885   :  { %v1667_v55 = vsub.f32 %v1634_v35, %v1661_v53  ;;  %v1662_v51 = vmul.f32 0.03125, %v1647_v54 }
 0x887   :  { %v1668_v57 = vsub.f32 %v1635_v23, %v1662_v51  ;;  %v1673_v58 = vmul.f32 %v1667_v55, %v1667_v55 }
 0x889   :  { %v1679_v59 = vsel %vm86_vm1, %v1673_v58, 0.0  ;;  %v1674_v60 = vmul.f32 %v1668_v57, %v1668_v57 }
 0x88a   :  { %1680 = vadd.xlane.f32.xlu0 %v1679_v59 }
 0x88b   :  { %v1682_v61 = vsel %vm86_vm1, %v1674_v60, 0.0 }
 0x88c   :  { %1683 = vadd.xlane.f32.xlu1 %v1682_v61 }
 0x8b8   :  { %v1650_v62 = vpop.xlane.xlu0 %1649 }
 0x8b9   :  { %v1663_v33 = vmul.f32 0.03125, %v1650_v62 }
 0x8ba   :  { %v1653_v63 = vpop.xlane.xlu1 %1652 }
 0x8bb   :  { %v1669_v1 = vsub.f32 %v1636_v17, %v1663_v33  ;;  %v1664_v3 = vmul.f32 0.03125, %v1653_v63 }
 0x8bd   :  { %v1670_v5 = vsub.f32 %v1637_v40, %v1664_v3  ;;  %v1675_v2 = vmul.f32 %v1669_v1, %v1669_v1  ;;  %v2491_v3 = vld [vmem:[%s3171_s10] sm:$0xff]  }
 0x8be   :  { %2443 = vmatpush3.bf16.msra.mxu1 %v2491_v3 }
 0x8bf   :  { %v1685_v6 = vsel %vm86_vm1, %v1675_v2, 0.0  ;;  %v1676_v8 = vmul.f32 %v1670_v5, %v1670_v5  ;;  %2444 = vmatprep.subr.bf16.mxu1 %v2585_v0  ;;  %v2493_v2 = vld [vmem:[%s3171_s10 + $0x10] sm:$0xff]  }
 0x8c0   :  { %1686 = vadd.xlane.f32.xlu0 %v1685_v6  ;;  %v1656_v12 = vpop.xlane.xlu0 %1655  ;;  %v2494_v6 = vld [vmem:[%s3171_s10 + $0x18] sm:$0xff]  }
 0x8c1   :  { %v1665_v7 = vmul.f32 0.03125, %v1656_v12  ;;  %v1688_v9 = vsel %vm86_vm1, %v1676_v8, 0.0  ;;  %v2164_v8 = vld [vmem:[%s3172_s9] ss:$0 sm:$0xff] }
 0x8c2   :  { %1689 = vadd.xlane.f32.xlu1 %v1688_v9  ;;  %v1659_v10 = vpop.xlane.xlu1 %1658 }
 0x8c3   :  { %v1671_v11 = vsub.f32 %v1638_v28, %v1665_v7  ;;  %v1666_v19 = vmul.f32 0.03125, %v1659_v10 }
 0x8c5   :  { %v1672_v24 = vsub.f32 %v1639_v20, %v1666_v19  ;;  %v1677_v4 = vmul.f32 %v1671_v11, %v1671_v11 }
 0x8c7   :  { %v1691_v13 = vsel %vm86_vm1, %v1677_v4, 0.0  ;;  %v1678_v14 = vmul.f32 %v1672_v24, %v1672_v24 }
 0x8c8   :  { %1692 = vadd.xlane.f32.xlu0 %v1691_v13 }
 0x8c9   :  { %v1694_v15 = vsel %vm86_vm1, %v1678_v14, 0.0 }
 0x8ca   :  { %1695 = vadd.xlane.f32.xlu1 %v1694_v15 }
 0x917   :  { %v1681_v18 = vpop.xlane.xlu0 %1680 }
 0x918   :  { %v1697_v30 = vmul.f32 0.03125, %v1681_v18 }
 0x919   :  { %v1684_v35 = vpop.xlane.xlu1 %1683 }
 0x91a   :  { %v1703_v21 = vadd.f32 1e-12, %v1697_v30  ;;  %v1698_v22 = vmul.f32 0.03125, %v1684_v35 }
 0x91c   :  { %2543 = vrsqrt.f32 %v1703_v21  ;;  %v1704_v23 = vadd.f32 1e-12, %v1698_v22 }
 0x91e   :  { %2545 = vrsqrt.f32 %v1704_v23 }
 0x926   :  { %v2544_v26 = vpop.eup %2543 }
 0x927   :  { %v1715_v16 = vmul.f32 %v2544_v26, %v1667_v55 }
 0x928   :  { %v2546_v29 = vpop.eup %2545 }
 0x929   :  { %v1727_v31 = vmul.f32 %v2162_v27, %v1715_v16  ;;  %v1716_v32 = vmul.f32 %v2546_v29, %v1668_v57 }
 0x92b   :  { %v1728_v37 = vmul.f32 %v2162_v27, %v1716_v32  ;;  %v3061_v17 = vadd.f32 %v2163_v34, %v1727_v31 }
 0x92d   :  { %v3063_v38 = vadd.f32 %v2163_v34, %v1728_v37 }
 0x92f   :  { %v1745_v39 = vpack.c.bf16 %v3063_v38, %v3061_v17 }
 0x931   :  { %2431 = vmatmul.mubr.msk.bf16.vlgmr.msra.gmra.mrb[60].mxu0 %vm86_vm1, %v1745_v39 }
 0x932   :  { %2434 = vmatprep.mubr.msk.bf16.mxu0 %vm2586_vm0, %v2585_v0 }
 0x94d   :  { %v1687_v40 = vpop.xlane.xlu0 %1686 }
 0x94e   :  { %v1699_v41 = vmul.f32 0.03125, %v1687_v40 }
 0x94f   :  { %v1690_v42 = vpop.xlane.xlu1 %1689 }
 0x950   :  { %v1705_v43 = vadd.f32 1e-12, %v1699_v41  ;;  %v1700_v44 = vmul.f32 0.03125, %v1690_v42 }
 0x952   :  { %2547 = vrsqrt.f32 %v1705_v43  ;;  %v1706_v45 = vadd.f32 1e-12, %v1700_v44 }
 0x954   :  { %2549 = vrsqrt.f32 %v1706_v45 }
 0x955   :  { %v1693_v46 = vpop.xlane.xlu0 %1692 }
 0x956   :  { %v1701_v47 = vmul.f32 0.03125, %v1693_v46 }
 0x957   :  { %v1696_v25 = vpop.xlane.xlu1 %1695 }
 0x958   :  { %v1707_v28 = vadd.f32 1e-12, %v1701_v47  ;;  %v1702_v48 = vmul.f32 0.03125, %v1696_v25 }
 0x95a   :  { %2551 = vrsqrt.f32 %v1707_v28  ;;  %v1708_v49 = vadd.f32 1e-12, %v1702_v48 }
 0x95c   :  { %v2548_v20 = vpop.eup %2547  ;;  %2553 = vrsqrt.f32 %v1708_v49 }
 0x95d   :  { %v1717_v50 = vmul.f32 %v2548_v20, %v1669_v1 }
 0x95e   :  { %v2550_v52 = vpop.eup %2549 }
 0x95f   :  { %v1718_v53 = vmul.f32 %v2550_v52, %v1670_v5  ;;  %v1729_v54 = vmul.f32 %v2162_v27, %v1717_v50  ;;  %v2492_v5 = vld [vmem:[%s3171_s10 + $0x8] sm:$0xff]  }
 0x960   :  { %2445 = vmatpush3.bf16.msra.mxu1 %v2492_v5 }
 0x961   :  { %v1730_v55 = vmul.f32 %v2162_v27, %v1718_v53  ;;  %v3070_v51 = vadd.f32 %v2163_v34, %v1729_v54  ;;  %2446 = vmatprep.subr.bf16.mxu1 %v2585_v0 }
 0x963   :  { %v3072_v57 = vadd.f32 %v2163_v34, %v1730_v55 }
 0x964   :  { %v2552_v58 = vpop.eup %2551  ;;  %2447 = vmatpush3.bf16.msra.mxu1 %v2493_v2 }
 0x965   :  { %v1719_v59 = vmul.f32 %v2552_v58, %v1671_v11  ;;  %v1746_v60 = vpack.c.bf16 %v3072_v57, %v3070_v51  ;;  %2448 = vmatprep.subr.bf16.mxu1 %v2585_v0 }
 0x966   :  { %v2554_v61 = vpop.eup %2553 }
 0x967   :  { %v1720_v56 = vmul.f32 %v2554_v61, %v1672_v24  ;;  %2435 = vmatmul.mubr.msk.bf16.gmra.mrb[64].mxu0 %vm86_vm1, %v1746_v60  ;;  %v1731_v36 = vmul.f32 %v2162_v27, %v1719_v59 }
 0x968   :  { %2438 = vmatprep.mubr.msk.bf16.mxu0 %vm2586_vm0, %v2585_v0  ;;  %2449 = vmatpush3.bf16.msra.mxu1 %v2494_v6 }
 0x969   :  { %v1732_v62 = vmul.f32 %v2162_v27, %v1720_v56  ;;  %v3079_v33 = vadd.f32 %v2163_v34, %v1731_v36 }
 0x96b   :  { %v3081_v63 = vadd.f32 %v2163_v34, %v1732_v62 }
 0x96d   :  { %v1747_v1 = vpack.c.bf16 %v3081_v63, %v3079_v33 }
 0x96f   :  { %2439 = vmatmul.mubr.msk.bf16.gmra.mrb[68].mxu0 %vm86_vm1, %v1747_v1 }
 0xa04   :  { %v1814_v12 = vpop.f32.mrb[60].mxu0 }
 0xa05   :  { %v1815_v7 = vadd.f32 %v2164_v8, %v1814_v12  ;;  %v2432_v9 = vpop.f32.mrb[61].mxu0 }
 0xa06   :  { %v1817_v10 = vpop.f32.mrb[62].mxu0 }
 0xa07   :  { %v1837_v11 = vmul.f32 %v1815_v7, %v1815_v7  ;;  %v1818_v19 = vadd.f32 %v2164_v8, %v1817_v10  ;;  %v2433_v24 = vpop.f32.mrb[63].mxu0 }
 0xa09   :  { %v1843_v4 = vmul.f32 %v1837_v11, %v1815_v7  ;;  %v1838_v13 = vmul.f32 %v1818_v19, %v1818_v19 }
 0xa0b   :  { %v1849_v14 = vmul.f32 0.044715, %v1843_v4  ;;  %v1844_v15 = vmul.f32 %v1838_v13, %v1818_v19 }
 0xa0d   :  { %v1855_v18 = vadd.f32 %v1849_v14, %v1815_v7  ;;  %v1850_v30 = vmul.f32 0.044715, %v1844_v15 }
 0xa0f   :  { %v1861_v35 = vmul.f32 0.7978846, %v1855_v18  ;;  %v1856_v21 = vadd.f32 %v1850_v30, %v1818_v19 }
 0xa11   :  { %2555 = vtanh.f32 %v1861_v35  ;;  %v1862_v22 = vmul.f32 0.7978846, %v1856_v21 }
 0xa13   :  { %2557 = vtanh.f32 %v1862_v22 }
 0xa1b   :  { %v2556_v23 = vpop.eup %2555 }
 0xa1c   :  { %v1873_v26 = vadd.f32 1.0, %v2556_v23 }
 0xa1d   :  { %v2558_v27 = vpop.eup %2557 }
 0xa1e   :  { %v1879_v16 = vmul.f32 0.5, %v1873_v26  ;;  %v1874_v29 = vadd.f32 1.0, %v2558_v27  ;;  %v2170_v27 = vld [vmem:[%s3173_s11] ss:$0 sm:$0xff] }
 0xa20   :  { %v1880_v31 = vmul.f32 0.5, %v1874_v29  ;;  %v1885_v32 = vmul.f32 %v1879_v16, %v1815_v7 }
 0xa22   :  { %v1886_v34 = vmul.f32 %v1880_v31, %v1818_v19 }
 0xa24   :  { %v1891_v37 = vpack.c.bf16 %v1886_v34, %v1885_v32 }
 0xa26   :  { %2451 = vmatmul.mubr.msk.bf16.vlgmr.msra.gmra.mrb[60].mxu1 %vm1933_vm5, %v1891_v37 }
 0xa27   :  { %2454 = vmatprep.mubr.msk.bf16.mxu1 %vm2586_vm0, %v2585_v0 }
 0xa3a   :  { %v1822_v39 = vpop.f32.mrb[64].mxu0 }
 0xa3b   :  { %v1823_v40 = vadd.f32 %v2164_v8, %v1822_v39  ;;  %v2436_v41 = vpop.f32.mrb[65].mxu0 }
 0xa3c   :  { %v1825_v42 = vpop.f32.mrb[66].mxu0 }
 0xa3d   :  { %v1839_v43 = vmul.f32 %v1823_v40, %v1823_v40  ;;  %v1826_v44 = vadd.f32 %v2164_v8, %v1825_v42  ;;  %v2437_v45 = vpop.f32.mrb[67].mxu0 }
 0xa3f   :  { %v1845_v46 = vmul.f32 %v1839_v43, %v1823_v40  ;;  %v1840_v47 = vmul.f32 %v1826_v44, %v1826_v44 }
 0xa41   :  { %v1851_v25 = vmul.f32 0.044715, %v1845_v46  ;;  %v1846_v28 = vmul.f32 %v1840_v47, %v1826_v44 }
 0xa42   :  { %v1830_v48 = vpop.f32.mrb[68].mxu0 }
 0xa43   :  { %v1857_v49 = vadd.f32 %v1851_v25, %v1823_v40  ;;  %v1852_v20 = vmul.f32 0.044715, %v1846_v28  ;;  %v1831_v50 = vadd.f32 %v2164_v8, %v1830_v48  ;;  %v2440_v52 = vpop.f32.mrb[69].mxu0 }
 0xa44   :  { %v1833_v53 = vpop.f32.mrb[70].mxu0 }
 0xa45   :  { %v1863_v54 = vmul.f32 0.7978846, %v1857_v49  ;;  %v1858_v55 = vadd.f32 %v1852_v20, %v1826_v44  ;;  %v1841_v58 = vmul.f32 %v1831_v50, %v1831_v50  ;;  %v1834_v59 = vadd.f32 %v2164_v8, %v1833_v53  ;;  %v2441_v60 = vpop.f32.mrb[71].mxu0 }
 0xa47   :  { %2559 = vtanh.f32 %v1863_v54  ;;  %v1864_v61 = vmul.f32 0.7978846, %v1858_v55  ;;  %v1847_v56 = vmul.f32 %v1841_v58, %v1831_v50  ;;  %v1842_v36 = vmul.f32 %v1834_v59, %v1834_v59 }
 0xa49   :  { %2561 = vtanh.f32 %v1864_v61  ;;  %v1853_v62 = vmul.f32 0.044715, %v1847_v56  ;;  %v1848_v1 = vmul.f32 %v1842_v36, %v1834_v59 }
 0xa4b   :  { %v1859_v3 = vadd.f32 %v1853_v62, %v1831_v50  ;;  %v1854_v5 = vmul.f32 0.044715, %v1848_v1 }
 0xa4d   :  { %v1865_v2 = vmul.f32 0.7978846, %v1859_v3  ;;  %v1860_v6 = vadd.f32 %v1854_v5, %v1834_v59 }
 0xa4f   :  { %2563 = vtanh.f32 %v1865_v2  ;;  %v1866_v12 = vmul.f32 0.7978846, %v1860_v6 }
 0xa51   :  { %v2560_v7 = vpop.eup %2559  ;;  %2565 = vtanh.f32 %v1866_v12 }
 0xa52   :  { %v1875_v9 = vadd.f32 1.0, %v2560_v7 }
 0xa53   :  { %v2562_v10 = vpop.eup %2561 }
 0xa54   :  { %v1881_v11 = vmul.f32 0.5, %v1875_v9  ;;  %v1876_v8 = vadd.f32 1.0, %v2562_v10 }
 0xa56   :  { %v1882_v19 = vmul.f32 0.5, %v1876_v8  ;;  %v1887_v24 = vmul.f32 %v1881_v11, %v1823_v40 }
 0xa58   :  { %v1888_v4 = vmul.f32 %v1882_v19, %v1826_v44 }
 0xa59   :  { %v2564_v13 = vpop.eup %2563 }
 0xa5a   :  { %v1877_v14 = vadd.f32 1.0, %v2564_v13  ;;  %v1892_v15 = vpack.c.bf16 %v1888_v4, %v1887_v24 }
 0xa5b   :  { %v2566_v18 = vpop.eup %2565 }
 0xa5c   :  { %v1883_v30 = vmul.f32 0.5, %v1877_v14  ;;  %v1878_v35 = vadd.f32 1.0, %v2566_v18  ;;  %2455 = vmatmul.mubr.msk.bf16.gmra.mrb[64].mxu1 %vm1933_vm5, %v1892_v15 }
 0xa5d   :  { %2458 = vmatprep.mubr.msk.bf16.mxu1 %vm2586_vm0, %v2585_v0 }
 0xa5e   :  { %v1884_v21 = vmul.f32 0.5, %v1878_v35  ;;  %v1889_v22 = vmul.f32 %v1883_v30, %v1831_v50 }
 0xa60   :  { %v1890_v23 = vmul.f32 %v1884_v21, %v1834_v59 }
 0xa62   :  { %v1893_v26 = vpack.c.bf16 %v1890_v23, %v1889_v22 }
 0xa64   :  { %2459 = vmatmul.mubr.msk.bf16.gmra.mrb[68].mxu1 %vm1933_vm5, %v1893_v26 }
 0xaf9   :  { %v1977_v16 = vpop.f32.mrb[60].mxu1 }
 0xafa   :  { %v1978_v29 = vadd.f32 %v2170_v27, %v1977_v16  ;;  %v2452_v31 = vpop.f32.mrb[61].mxu1 }
 0xafb   :  { %v1980_v32 = vpop.f32.mrb[62].mxu1 }
 0xafc   :  { %v1981_v34 = vadd.f32 %v2170_v27, %v1980_v32  ;;  %v2453_v37 = vpop.f32.mrb[63].mxu1  ;;  %v2000_v39 = vadd.f32 %v1978_v29, %v3061_v17  ;;  %v2178_v32 = vld [vmem:[%s3174_s12] ss:$0 sm:$0xff] }
 0xafe   :  { %v2008_v0 = vsel %vm86_vm1, %v2000_v39, 0.0  ;;  %v2001_v40 = vadd.f32 %v1981_v34, %v3063_v38 }
 0xaff   :  { %2009 = vadd.xlane.f32.xlu0 %v2008_v0 }
 0xb00   :  { %v2011_v41 = vsel %vm86_vm1, %v2001_v40, 0.0 }
 0xb01   :  { %2012 = vadd.xlane.f32.xlu1 %v2011_v41 }
 0xb2f   :  { %v1985_v42 = vpop.f32.mrb[64].mxu1 }
 0xb30   :  { %v1986_v43 = vadd.f32 %v2170_v27, %v1985_v42  ;;  %v2456_v44 = vpop.f32.mrb[65].mxu1 }
 0xb31   :  { %v1988_v45 = vpop.f32.mrb[66].mxu1 }
 0xb32   :  { %v1989_v46 = vadd.f32 %v2170_v27, %v1988_v45  ;;  %v2457_v47 = vpop.f32.mrb[67].mxu1  ;;  %v2002_v25 = vadd.f32 %v1986_v43, %v3070_v51 }
 0xb34   :  { %v2014_v28 = vsel %vm86_vm1, %v2002_v25, 0.0  ;;  %v2003_v17 = vadd.f32 %v1989_v46, %v3072_v57 }
 0xb35   :  { %2015 = vadd.xlane.f32.xlu0 %v2014_v28 }
 0xb36   :  { %v2017_v48 = vsel %vm86_vm1, %v2003_v17, 0.0 }
 0xb37   :  { %2018 = vadd.xlane.f32.xlu1 %v2017_v48  ;;  %v1993_v38 = vpop.f32.mrb[68].mxu1 }
 0xb38   :  { %v1994_v49 = vadd.f32 %v2170_v27, %v1993_v38  ;;  %v2460_v20 = vpop.f32.mrb[69].mxu1 }
 0xb39   :  { %v1996_v50 = vpop.f32.mrb[70].mxu1 }
 0xb3a   :  { %v1997_v52 = vadd.f32 %v2170_v27, %v1996_v50  ;;  %v2461_v53 = vpop.f32.mrb[71].mxu1  ;;  %v2004_v54 = vadd.f32 %v1994_v49, %v3079_v33 }
 0xb3c   :  { %v2020_v55 = vsel %vm86_vm1, %v2004_v54, 0.0  ;;  %v2005_v51 = vadd.f32 %v1997_v52, %v3081_v63 }
 0xb3d   :  { %2021 = vadd.xlane.f32.xlu0 %v2020_v55 }
 0xb3e   :  { %v2023_v58 = vsel %vm86_vm1, %v2005_v51, 0.0 }
 0xb3f   :  { %2024 = vadd.xlane.f32.xlu1 %v2023_v58 }
 0xb8c   :  { %v2010_v57 = vpop.xlane.xlu0 %2009 }
 0xb8d   :  { %v2026_v59 = vmul.f32 0.03125, %v2010_v57 }
 0xb8e   :  { %v2013_v60 = vpop.xlane.xlu1 %2012 }
 0xb8f   :  { %v2032_v61 = vsub.f32 %v2000_v39, %v2026_v59  ;;  %v2027_v56 = vmul.f32 0.03125, %v2013_v60  ;;  %v2179_v39 = vld [vmem:[%s3175_s13] ss:$0 sm:$0xff] }
 0xb91   :  { %v2033_v36 = vsub.f32 %v2001_v40, %v2027_v56  ;;  %v2038_v62 = vmul.f32 %v2032_v61, %v2032_v61 }
 0xb93   :  { %v2044_v1 = vsel %vm86_vm1, %v2038_v62, 0.0  ;;  %v2039_v3 = vmul.f32 %v2033_v36, %v2033_v36 }
 0xb94   :  { %2045 = vadd.xlane.f32.xlu0 %v2044_v1 }
 0xb95   :  { %v2047_v33 = vsel %vm86_vm1, %v2039_v3, 0.0 }
 0xb96   :  { %2048 = vadd.xlane.f32.xlu1 %v2047_v33 }
 0xbc2   :  { %v2016_v5 = vpop.xlane.xlu0 %2015 }
 0xbc3   :  { %v2028_v63 = vmul.f32 0.03125, %v2016_v5 }
 0xbc4   :  { %v2019_v2 = vpop.xlane.xlu1 %2018 }
 0xbc5   :  { %v2034_v6 = vsub.f32 %v2002_v25, %v2028_v63  ;;  %v2029_v12 = vmul.f32 0.03125, %v2019_v2 }
 0xbc7   :  { %v2035_v7 = vsub.f32 %v2003_v17, %v2029_v12  ;;  %v2040_v9 = vmul.f32 %v2034_v6, %v2034_v6 }
 0xbc9   :  { %v2050_v10 = vsel %vm86_vm1, %v2040_v9, 0.0  ;;  %v2041_v11 = vmul.f32 %v2035_v7, %v2035_v7 }
 0xbca   :  { %2051 = vadd.xlane.f32.xlu0 %v2050_v10  ;;  %v2022_v8 = vpop.xlane.xlu0 %2021 }
 0xbcb   :  { %v2030_v19 = vmul.f32 0.03125, %v2022_v8  ;;  %v2053_v24 = vsel %vm86_vm1, %v2041_v11, 0.0 }
 0xbcc   :  { %2054 = vadd.xlane.f32.xlu1 %v2053_v24  ;;  %v2025_v4 = vpop.xlane.xlu1 %2024 }
 0xbcd   :  { %v2036_v13 = vsub.f32 %v2004_v54, %v2030_v19  ;;  %v2031_v14 = vmul.f32 0.03125, %v2025_v4 }
 0xbcf   :  { %v2037_v15 = vsub.f32 %v2005_v51, %v2031_v14  ;;  %v2042_v18 = vmul.f32 %v2036_v13, %v2036_v13 }
 0xbd1   :  { %v2056_v30 = vsel %vm86_vm1, %v2042_v18, 0.0  ;;  %v2043_v35 = vmul.f32 %v2037_v15, %v2037_v15 }
 0xbd2   :  { %2057 = vadd.xlane.f32.xlu0 %v2056_v30 }
 0xbd3   :  { %v2059_v21 = vsel %vm86_vm1, %v2043_v35, 0.0 }
 0xbd4   :  { %2060 = vadd.xlane.f32.xlu1 %v2059_v21 }
 0xc21   :  { %v2046_v22 = vpop.xlane.xlu0 %2045 }
 0xc22   :  { %v2062_v23 = vmul.f32 0.03125, %v2046_v22 }
 0xc23   :  { %v2049_v26 = vpop.xlane.xlu1 %2048 }
 0xc24   :  { %v2068_v27 = vadd.f32 1e-12, %v2062_v23  ;;  %v2063_v16 = vmul.f32 0.03125, %v2049_v26 }
 0xc26   :  { %2567 = vrsqrt.f32 %v2068_v27  ;;  %v2069_v29 = vadd.f32 1e-12, %v2063_v16 }
 0xc28   :  { %2569 = vrsqrt.f32 %v2069_v29 }
 0xc30   :  { %v2568_v31 = vpop.eup %2567 }
 0xc31   :  { %v2080_v34 = vmul.f32 %v2568_v31, %v2032_v61 }
 0xc32   :  { %v2570_v37 = vpop.eup %2569 }
 0xc33   :  { %v2092_v0 = vmul.f32 %v2178_v32, %v2080_v34  ;;  %v2081_v40 = vmul.f32 %v2570_v37, %v2033_v36 }
 0xc35   :  { %v2104_v41 = vadd.f32 %v2179_v39, %v2092_v0  ;;  %v2093_v42 = vmul.f32 %v2178_v32, %v2081_v40 }
 0xc37   :  { %2110 = vst.msk [vmem:[%s3176_s14] sm:$0xff] %vm86_vm1, %v2104_v41  ;;  %v2105_v43 = vadd.f32 %v2179_v39, %v2093_v42 }
 0xc39   :  { %2111 = vst.msk [vmem:[%s3176_s14 + $0x8] sm:$0xff] %vm86_vm1, %v2105_v43 }
 0xc57   :  { %v2052_v44 = vpop.xlane.xlu0 %2051 }
 0xc58   :  { %v2064_v45 = vmul.f32 0.03125, %v2052_v44 }
 0xc59   :  { %v2055_v46 = vpop.xlane.xlu1 %2054 }
 0xc5a   :  { %v2070_v47 = vadd.f32 1e-12, %v2064_v45  ;;  %v2065_v25 = vmul.f32 0.03125, %v2055_v46 }
 0xc5c   :  { %2571 = vrsqrt.f32 %v2070_v47  ;;  %v2071_v28 = vadd.f32 1e-12, %v2065_v25 }
 0xc5e   :  { %2573 = vrsqrt.f32 %v2071_v28 }
 0xc5f   :  { %v2058_v17 = vpop.xlane.xlu0 %2057 }
 0xc60   :  { %v2066_v48 = vmul.f32 0.03125, %v2058_v17 }
 0xc61   :  { %v2061_v38 = vpop.xlane.xlu1 %2060 }
 0xc62   :  { %v2072_v49 = vadd.f32 1e-12, %v2066_v48  ;;  %v2067_v20 = vmul.f32 0.03125, %v2061_v38 }
 0xc64   :  { %2575 = vrsqrt.f32 %v2072_v49  ;;  %v2073_v50 = vadd.f32 1e-12, %v2067_v20 }
 0xc66   :  { %v2572_v52 = vpop.eup %2571  ;;  %2577 = vrsqrt.f32 %v2073_v50 }
 0xc67   :  { %v2082_v53 = vmul.f32 %v2572_v52, %v2034_v6 }
 0xc68   :  { %v2574_v54 = vpop.eup %2573 }
 0xc69   :  { %v2094_v55 = vmul.f32 %v2178_v32, %v2082_v53  ;;  %v2083_v51 = vmul.f32 %v2574_v54, %v2035_v7 }
 0xc6b   :  { %v2106_v58 = vadd.f32 %v2179_v39, %v2094_v55  ;;  %v2095_v57 = vmul.f32 %v2178_v32, %v2083_v51 }
 0xc6d   :  { %2112 = vst.msk [vmem:[%s3176_s14 + $0x10] sm:$0xff] %vm86_vm1, %v2106_v58  ;;  %v2107_v59 = vadd.f32 %v2179_v39, %v2095_v57 }
 0xc6e   :  { %v2576_v60 = vpop.eup %2575 }
 0xc6f   :  { %2113 = vst.msk [vmem:[%s3176_s14 + $0x18] sm:$0xff] %vm86_vm1, %v2107_v59  ;;  %v2084_v61 = vmul.f32 %v2576_v60, %v2036_v13 }
 0xc70   :  { %v2578_v56 = vpop.eup %2577 }
 0xc71   :  { %v2096_v36 = vmul.f32 %v2178_v32, %v2084_v61  ;;  %v2085_v62 = vmul.f32 %v2578_v56, %v2037_v15 }
 0xc73   :  { %v2108_v1 = vadd.f32 %v2179_v39, %v2096_v36  ;;  %v2097_v3 = vmul.f32 %v2178_v32, %v2085_v62 }
 0xc75   :  { %2114 = vst.msk [vmem:[%s3176_s14 + $0x20] sm:$0xff] %vm86_vm1, %v2108_v1  ;;  %v2109_v33 = vadd.f32 %v2179_v39, %v2097_v3 }
 0xc77   :  { %2115 = vst.msk [vmem:[%s3176_s14 + $0x28] sm:$0xff] %vm86_vm1, %v2109_v33 }

// kernel: _lambda_.9
= control target key start
LH: loop header
LB: loop body
LE: loop exit
PB: predicated region body
PF: predicated region fallthrough
CT: control target
= control target key end

     0   :  { %v812_v0 = vmov 0.0|0.0   ;;  %v813_v3 = vmov 0.0   ;;  %v814_v4 = vmov 1983009808   ;;  %v48_v6 = vlaneseq  ;;  %s817_s28 = smov 96   ;;  %s978_s3 = inlined_call_operand.vmem [shape: f32[16,48], index: 3, kind: input, shape index: {}]   ;;  %s979_s2 = inlined_call_operand.vmem [shape: bf16[32,48], index: 2, kind: input, shape index: {}]   ;;  %s980_s0 = inlined_call_operand.vmem [shape: f32[3,2,32], index: 0, kind: input, shape index: {}]   ;;  %s981_s1 = inlined_call_operand.vmem [shape: f32[3,2,1], index: 1, kind: input, shape index: {}]   ;;  %s982_s5 = inlined_call_operand.vmem [shape: f32[1,48], index: 5, kind: input, shape index: {}]   ;;  %s983_s4 = inlined_call_operand.vmem [shape: f32[1,48], index: 4, kind: input, shape index: {}]   ;;  %s984_s6 = inlined_call_operand.vmem [shape: f32[16,16], index: 6, kind: input, shape index: {}]   ;;  %s985_s8 = inlined_call_operand.vmem [shape: f32[16,1], index: 8, kind: input, shape index: {}]   ;;  %s986_s9 = inlined_call_operand.<no memory space> [shape: f32[1,1], index: 9, kind: input, shape index: {}]   ;;  %s987_s7 = inlined_call_operand.vmem [shape: f32[1,16], index: 7, kind: input, shape index: {}]   ;;  %s988_s10 = inlined_call_operand.vmem [shape: f32[2,1], index: 10, kind: output, shape index: {}]  }
   0x1   :  { %767 = vmatprep.subr.bf16.mxu1 %v812_v0  ;;  %v153_v1 = vld [vmem:[%s978_s3] sm:$0xff]  ;;  %v154_v2 = vld [vmem:[%s978_s3 + $0x8] sm:$0xff]  ;;  %724 = vmatprep.subr.bf16.mxu0 %v813_v3  ;;  %v46_v5 = vunpack.c.l.s4 %v814_v4  ;;  %vm815_vm0 = vmmov 0   ;;  %vm85_vm1 = vcmask 261120   ;;  %v816_v20 = vmov 0  }
   0x2   :  { %v883_v7 = vpack.c.bf16 %v154_v2, %v153_v1  ;;  %v792_v8 = vld [vmem:[%s979_s2] sm:$0xff]   ;;  %736 = vmatprep.mubr.msk.f32.mxu1 %vm815_vm0, %v813_v3  ;;  %728 = vmatprep.mubr.msk.bf16.mxu0 %vm815_vm0, %v813_v3  ;;  %v49_v11 = vshrl.u32 %v48_v6, 7  ;;  %v793_v12 = vld [vmem:[%s979_s2 + $0x8] sm:$0xff]   ;;  %vm149_vm2 = vcmask 386048   ;;  %vm164_vm3 = vcmask 130048  }
   0x3   :  { %v38_v9 = vld [vmem:[%s980_s0] sm:$0x3]  ;;  %v47_v10 = vunpack.c.0.s8 %v46_v5  ;;  %725 = vmatpush3.bf16.msra.mxu0 %v792_v8  ;;  %v39_v13 = vld [vmem:[%s980_s0 + $0x2] sm:$0x3]  ;;  %790 = vset.pattern.permute.xlu1 %v816_v20  ;;  %vm683_vm4 = vcmask 1024  }
   0x4   :  { %769 = vmatpush3.bf16.msra.mxu1 %v883_v7  ;;  %726 = vmatprep.subr.bf16.mxu0 %v813_v3  ;;  %v44_v14 = vcombine.low %v38_v9, %v39_v13  ;;  %v689_v16 = vld.sshfl [vmem:[%s980_s0 + $0x4] sm:$0x3 pattern:$0x76325410]  ;;  %v157_v21 = vld [vmem:[%s981_s1] sm:$0x3] }
   0x5   :  { %v50_v15 = vsub.s32 %v47_v10, %v49_v11  ;;  %770 = vmatprep.subr.bf16.mxu1 %v812_v0  ;;  %791 = vset.pattern.permute.xlu0 %v816_v20  ;;  %v270_v22 = vsub.f32 1.0, %v157_v21  ;;  %v921_v23 = vld [vmem:[%s982_s5] ss:$0 sm:$0xff]  ;;  %s819_s5 = smov 112   ;;  %v696_v62 = vld [vmem:[%s981_s1 + $0x2] sm:$0x3] }
   0x6   :  { %266 = vperm.xlu1 %790, %v157_v21   ;;  %v690_v27 = vld [vmem:[%s983_s4] ss:$0 sm:$0xff]  ;;  %s818_s4 = smov 32   ;;  %v389_v8 = vsub.f32 1.0, %v696_v62 }
   0x7   :  { %737 = vmatmul.mubr.f32.vlgmr.msra.gmra.mrb[0].mxu1 %v813_v3  ;;  %v51_v17 = vrot.slane %v44_v14, %v50_v15  ;;  %727 = vmatpush3.bf16.msra.mxu0 %v793_v12 }
   0x8   :  { %772 = vmatpush3.bf16.msra.mxu1 %v883_v7  ;;  %743 = vmatprep.mubr.msk.f32.mxu1 %vm815_vm0, %v813_v3 }
   0x9   :  { %v59_v18 = vcombine.low %v51_v17, %v689_v16  ;;  %773 = vmatprep.subr.bf16.mxu1 %v812_v0  ;;  %776 = vmatprep.subr.bf16.mxu0 %v812_v0 }
   0xa   :  { %273 = vperm.xlu1 %790, %v270_v22  }
   0xb   :  { %v61_v19 = vpack.c.bf16 %v59_v18, %v59_v18 }
   0xd   :  { %729 = vmatmul.mubr.msk.bf16.vlgmr.msra.gmra.mrb[0].mxu0 %vm85_vm1, %v61_v19 }
   0xe   :  { %757 = vmatprep.mubr.msk.f32.mxu0 %vm815_vm0, %v813_v3 }
  0x85   :  { %v267_v48 = vpop.permute.xlu1 %266 }
  0x89   :  { %v274_v53 = vpop.permute.xlu1 %273 }
  0x8a   :  { %v276_v55 = vmul.f32 0.0, %v274_v53  ;;  %v602_v53 = vld [vmem:[%s985_s8 + $0x8] sm:$0xff] }
  0xda   :  { %v234_v24 = vpop.f32.mrb[0].mxu1 }
  0xdb   :  { %v235_v25 = vadd.f32 %v921_v23, %v234_v24  ;;  %v738_v26 = vpop.f32.mrb[1].mxu1 }
  0xdd   :  { %246 = vrot.lane.b32.xlu0 %v235_v25, %s817_s28 }
  0xe0   :  { %v123_v28 = vpop.f32.mrb[0].mxu0 }
  0xe1   :  { %v124_v29 = vadd.f32 %v690_v27, %v123_v28  ;;  %v730_v30 = vpop.f32.mrb[1].mxu0  ;;  %v699_v27 = vld [vmem:[%s981_s1 + $0x4] sm:$0x3] }
  0xe2   :  { %v126_v31 = vpop.f32.mrb[2].mxu0 }
  0xe3   :  { %v130_v32 = vcombine.high %v124_v29, %v124_v29  ;;  %v137_v33 = vrot.slane %v124_v29, %v50_v15  ;;  %v731_v34 = vpop.f32.mrb[3].mxu0 }
  0xe5   :  { %v144_v35 = vrot.slane %v130_v32, %v50_v15  ;;  %v145_v36 = vcombine.high %v137_v33, %v137_v33  ;;  %150 = vst.msk [vmem:[#allocation2] sm:$0x3] %vm149_vm2, %v137_v33 }
  0xe7   :  { %151 = vst.msk [vmem:[#allocation2 + $0x2] sm:$0x3] %vm149_vm2, %v145_v36  ;;  %152 = vst.msk [vmem:[#allocation2 + $0x4] sm:$0x3] %vm149_vm2, %v144_v35  ;;  %v508_v35 = vsub.f32 1.0, %v699_v27 }
  0xec   :  { %v156_v37 = vld [vmem:[#allocation2] sm:$0x3] }
  0xed   :  { %v238_v38 = vadd.f32 %v235_v25, %v156_v37 }
  0xee   :  { %v279_v63 = vld [vmem:[#allocation2 + $0x2] sm:$0x3]  ;;  %v398_v28 = vld [vmem:[#allocation2 + $0x4] sm:$0x3] }
  0xef   :  { %v695_v39 = vmul.f32 -1.442695, %v238_v38  ;;  %v517_v38 = vld [vmem:[%s984_s6 + $0x8] sm:$0xff] }
  0xf1   :  { %794 = vpow2.f32 %v695_v39 }
  0xfb   :  { %v795_v40 = vpop.eup %794 }
  0xfc   :  { %v242_v41 = vadd.f32 1.0, %v795_v40 }
  0xfe   :  { %796 = vrcp.f32 %v242_v41 }
 0x108   :  { %v797_v42 = vpop.eup %796 }
 0x109   :  { %v256_v49 = vsub.f32 1.0, %v797_v42  ;;  %v262_v51 = vmul.f32 0.0, %v797_v42 }
 0x14f   :  { %v247_v43 = vpop.permute.xlu0 %246 }
 0x150   :  { %v249_v44 = vmul.f32 %v797_v42, %v247_v43 }
 0x152   :  { %251 = vrot.lane.b32.xlu0 %v249_v44, %s818_s4 }
 0x1c4   :  { %v252_v45 = vpop.permute.xlu0 %251 }
 0x1c5   :  { %v254_v46 = vadd.f32 %v252_v45, %v156_v37  ;;  %v516_v37 = vld [vmem:[%s984_s6] sm:$0xff] }
 0x1c6   :  { %v777_v39 = vpack.c.bf16 %v517_v38, %v516_v37 }
 0x1c7   :  { %798 = vtanh.f32 %v254_v46 }
 0x1c8   :  { %778 = vmatpush3.bf16.msra.mxu0 %v777_v39 }
 0x1d1   :  { %v799_v47 = vpop.eup %798 }
 0x1d2   :  { %258 = vrot.lane.b32.xlu0 %v799_v47, %s819_s5 }
 0x244   :  { %v259_v50 = vpop.permute.xlu0 %258 }
 0x245   :  { %v261_v52 = vmul.f32 %v259_v50, %v256_v49 }
 0x247   :  { %v263_v54 = vadd.f32 %v262_v51, %v261_v52  ;;  %v601_v52 = vld [vmem:[%s985_s8] sm:$0xff] }
 0x249   :  { %v269_v56 = vmul.f32 %v267_v48, %v263_v54  ;;  %v780_v54 = vpack.c.bf16 %v602_v53, %v601_v52 }
 0x24b   :  { %v277_v57 = vadd.f32 %v276_v55, %v269_v56  ;;  %v15_v55 = vstv %s986_s9  ;;  %v702_v56 = vld [vmem:[%s987_s7] ss:$0 sm:$0xff] }
 0x24c   :  { %16 = vst [vmem:[#allocation3] sm:$0x1] %v15_v55 }
 0x24d   :  { %283 = vrot.lane.b32.xlu1 %v277_v57, %s819_s5 }
 0x2bf   :  { %v284_v58 = vpop.permute.xlu1 %283 }
 0x2c0   :  { %744 = vmatmul.mubr.msk.f32.vlgmr.msra.gmra.mrb[2].mxu1 %vm164_vm3, %v284_v58 }
 0x2c1   :  { %775 = vmatpush3.bf16.msra.mxu1 %v883_v7  ;;  %750 = vmatprep.mubr.msk.f32.mxu1 %vm815_vm0, %v813_v3 }
 0x2c2   :  { %779 = vmatprep.subr.bf16.mxu1 %v812_v0 }
 0x393   :  { %v353_v59 = vpop.f32.mrb[2].mxu1 }
 0x394   :  { %v354_v60 = vadd.f32 %v921_v23, %v353_v59  ;;  %v745_v61 = vpop.f32.mrb[3].mxu1 }
 0x395   :  { %v704_v61 = vld [vmem:[#allocation3] ss:$0 sm:$0xff] }
 0x396   :  { %365 = vrot.lane.b32.xlu0 %v354_v60, %s817_s28  ;;  %v357_v1 = vadd.f32 %v354_v60, %v279_v63 }
 0x398   :  { %v698_v2 = vmul.f32 -1.442695, %v357_v1 }
 0x39a   :  { %385 = vperm.xlu0 %791, %v696_v62   ;;  %800 = vpow2.f32 %v698_v2 }
 0x3a4   :  { %v801_v4 = vpop.eup %800 }
 0x3a5   :  { %v361_v5 = vadd.f32 1.0, %v801_v4 }
 0x3a7   :  { %802 = vrcp.f32 %v361_v5 }
 0x3b1   :  { %v803_v6 = vpop.eup %802 }
 0x3b2   :  { %v375_v13 = vsub.f32 1.0, %v803_v6  ;;  %v381_v16 = vmul.f32 %v803_v6, %v277_v57 }
 0x408   :  { %v366_v0 = vpop.permute.xlu0 %365 }
 0x409   :  { %v368_v7 = vmul.f32 %v803_v6, %v366_v0 }
 0x40b   :  { %370 = vrot.lane.b32.xlu1 %v368_v7, %s818_s4 }
 0x40f   :  { %392 = vperm.xlu1 %790, %v389_v8  }
 0x419   :  { %v386_v17 = vpop.permute.xlu0 %385 }
 0x47d   :  { %v371_v9 = vpop.permute.xlu1 %370 }
 0x47e   :  { %v373_v10 = vadd.f32 %v371_v9, %v279_v63 }
 0x480   :  { %804 = vtanh.f32 %v373_v10 }
 0x48a   :  { %v805_v11 = vpop.eup %804 }
 0x48b   :  { %377 = vrot.lane.b32.xlu1 %v805_v11, %s819_s5 }
 0x48e   :  { %v393_v12 = vpop.permute.xlu1 %392 }
 0x48f   :  { %v395_v19 = vmul.f32 %v393_v12, %v277_v57 }
 0x4fd   :  { %v378_v14 = vpop.permute.xlu1 %377 }
 0x4fe   :  { %v380_v15 = vmul.f32 %v378_v14, %v375_v13 }
 0x500   :  { %v382_v18 = vadd.f32 %v381_v16, %v380_v15 }
 0x502   :  { %v388_v20 = vmul.f32 %v386_v17, %v382_v18 }
 0x504   :  { %v396_v21 = vadd.f32 %v395_v19, %v388_v20 }
 0x506   :  { %402 = vrot.lane.b32.xlu0 %v396_v21, %s819_s5 }
 0x578   :  { %v403_v22 = vpop.permute.xlu0 %402 }
 0x579   :  { %751 = vmatmul.mubr.msk.f32.vlgmr.msra.gmra.mrb[4].mxu1 %vm164_vm3, %v403_v22 }
 0x57a   :  { %764 = vmatprep.mubr.msk.f32.mxu1 %vm815_vm0, %v813_v3  ;;  %781 = vmatpush3.bf16.msra.mxu1 %v780_v54 }
 0x64c   :  { %v472_v24 = vpop.f32.mrb[4].mxu1 }
 0x64d   :  { %v473_v25 = vadd.f32 %v921_v23, %v472_v24  ;;  %v752_v26 = vpop.f32.mrb[5].mxu1 }
 0x64f   :  { %484 = vrot.lane.b32.xlu1 %v473_v25, %s817_s28  ;;  %v476_v29 = vadd.f32 %v473_v25, %v398_v28 }
 0x651   :  { %v701_v30 = vmul.f32 -1.442695, %v476_v29 }
 0x653   :  { %504 = vperm.xlu1 %790, %v699_v27   ;;  %806 = vpow2.f32 %v701_v30 }
 0x65d   :  { %v807_v31 = vpop.eup %806 }
 0x65e   :  { %v480_v32 = vadd.f32 1.0, %v807_v31 }
 0x660   :  { %808 = vrcp.f32 %v480_v32 }
 0x66a   :  { %v809_v33 = vpop.eup %808 }
 0x66b   :  { %v494_v42 = vsub.f32 1.0, %v809_v33  ;;  %v500_v44 = vmul.f32 %v809_v33, %v396_v21 }
 0x6c1   :  { %v485_v3 = vpop.permute.xlu1 %484 }
 0x6c2   :  { %v487_v34 = vmul.f32 %v809_v33, %v485_v3 }
 0x6c4   :  { %489 = vrot.lane.b32.xlu0 %v487_v34, %s818_s4 }
 0x6c8   :  { %511 = vperm.xlu0 %791, %v508_v35  }
 0x6d2   :  { %v505_v41 = vpop.permute.xlu1 %504 }
 0x736   :  { %v490_v23 = vpop.permute.xlu0 %489 }
 0x737   :  { %v492_v36 = vadd.f32 %v490_v23, %v398_v28 }
 0x739   :  { %810 = vtanh.f32 %v492_v36 }
 0x743   :  { %v811_v40 = vpop.eup %810 }
 0x744   :  { %496 = vrot.lane.b32.xlu1 %v811_v40, %s819_s5 }
 0x747   :  { %v512_v46 = vpop.permute.xlu0 %511 }
 0x748   :  { %v514_v48 = vmul.f32 %v512_v46, %v396_v21 }
 0x7b6   :  { %v497_v43 = vpop.permute.xlu1 %496 }
 0x7b7   :  { %v499_v45 = vmul.f32 %v497_v43, %v494_v42 }
 0x7b9   :  { %v501_v47 = vadd.f32 %v500_v44, %v499_v45 }
 0x7bb   :  { %v507_v49 = vmul.f32 %v505_v41, %v501_v47 }
 0x7bd   :  { %v515_v50 = vadd.f32 %v514_v48, %v507_v49 }
 0x7bf   :  { %526 = vrot.lane.b32.xlu0 %v515_v50, %s819_s5 }
 0x831   :  { %v527_v51 = vpop.permute.xlu0 %526 }
 0x832   :  { %758 = vmatmul.mubr.msk.f32.vlgmr.msra.gmra.mrb[4].mxu0 %vm164_vm3, %v527_v51 }
 0x905   :  { %v596_v57 = vpop.f32.mrb[4].mxu0 }
 0x906   :  { %v597_v58 = vadd.f32 %v702_v56, %v596_v57  ;;  %v759_v59 = vpop.f32.mrb[5].mxu0 }
 0x908   :  { %v600_v60 = vmax.f32 %v597_v58, 0.0 }
 0x90a   :  { %765 = vmatmul.mubr.msk.f32.vlgmr.msra.gmra.mrb[6].mxu1 %vm164_vm3, %v600_v60 }
 0x9dd   :  { %v679_v62 = vpop.f32.mrb[6].mxu1 }
 0x9de   :  { %v680_v63 = vadd.f32 %v704_v61, %v679_v62  ;;  %v766_v1 = vpop.f32.mrb[7].mxu1 }
 0x9e0   :  { %684 = vst.msk [vmem:[%s988_s10] sm:$0x3] %vm683_vm4, %v680_v63 }

</bundles_post_ra>
